<compile_context>
chip_gen: v6e
topology: v6e:2x2x1
jax: 0.10.0
libtpu: 0.0.40
codegen_flags: <defaults>
</compile_context>

<pallas_src>
import functools

import jax
import jax.numpy as jnp
from jax import lax
from jax.experimental import pallas as pl
from jax.experimental.pallas import tpu as pltpu


def _conv_kernel(x_ref, w_ref, scale_ref, shift_ref, o_ref, *,
                 tap_offsets, q, apply_relu):
    # x_ref:     [1, Npad, Cin]    zero-padded, row-major flattened image
    # w_ref:     [KH*KW, Cin, TC]  per-tap weight matrices
    # scale_ref: [1, TC]           per-channel scale (1.0 when bn is disabled)
    # shift_ref: [1, TC]           per-channel shift (bias [+ folded BN])
    # o_ref:     [1, Q, TC]        dense stride-1 conv output, row pitch = Wp
    tc = o_ref.shape[-1]
    acc = jnp.zeros((q, tc), jnp.float32)
    for t, d in enumerate(tap_offsets):                  # static unrolled taps
        patch = x_ref[0, pl.ds(d, q), :].astype(jnp.float32)          # [Q, Cin]
        acc += jnp.dot(patch, w_ref[t].astype(jnp.float32),
                       preferred_element_type=jnp.float32)            # [Q, TC]
    out = (acc * scale_ref[...].astype(jnp.float32)
           + shift_ref[...].astype(jnp.float32))
    if apply_relu:
        out = jnp.maximum(out, 0.0)
    o_ref[0] = out.astype(o_ref.dtype)


def conv2d_forward(x, w, b, *, stride=1, padding=1, relu=True, bn=None,
                   eps=1e-3):
    """
    x:  [B, Cin, H, W]  (NCHW, like PyTorch)
    w:  [Cout, Cin, KH, KW]   conv weight
    b:  [Cout]                conv bias
    bn: None or (gamma, beta, running_mean, running_var)  -> folded (inference)
    returns: [B, Cout, OH, OW]
    """
    B, Cin, H, W = x.shape
    Cout, Cin_w, KH, KW = w.shape
    assert Cin_w == Cin
    Hp, Wp = H + 2 * padding, W + 2 * padding
    OHd, OWd = Hp - KH + 1, Wp - KW + 1          # dense (stride-1) output dims
    Q = OHd * Wp                                 # flat rows computed (pitch Wp)
    Npad = Hp * Wp + (KW - 1)                    # extra zero rows keep taps in-bounds

    # NCHW -> NHWC -> zero-pad spatially -> flatten spatial (row-major).
    x_nhwc = jnp.transpose(x, (0, 2, 3, 1))
    x_pad = jnp.pad(x_nhwc, ((0, 0), (padding, padding), (padding, padding), (0, 0)))
    x_flat = x_pad.reshape(B, Hp * Wp, Cin)
    x_flat = jnp.pad(x_flat, ((0, 0), (0, Npad - Hp * Wp), (0, 0)))

    # Weight: [Cout, Cin, KH, KW] -> [KH*KW, Cin, Cout] (one matmul per tap).
    w_taps = jnp.transpose(w, (2, 3, 1, 0)).reshape(KH * KW, Cin, Cout)
    w_taps = w_taps.astype(jnp.float32)

    # Fold conv bias (+ optional inference BatchNorm) into scale/shift.
    if bn is not None:
        gamma, beta, mean, var = bn
        s = gamma / jnp.sqrt(var + eps)
        scale = s
        shift = (b - mean) * s + beta
    else:
        scale = jnp.ones((Cout,), jnp.float32)
        shift = b
    scale = scale.reshape(1, Cout).astype(jnp.float32)
    shift = shift.reshape(1, Cout).astype(jnp.float32)

    tap_offsets = tuple(kh * Wp + kw for kh in range(KH) for kw in range(KW))

    # Lane-dense Cout tiling: 128-wide tiles when possible, else full Cout.
    TC = 128 if (Cout % 128 == 0) else Cout
    n_ct = Cout // TC
    grid = (B, n_ct)

    kern = functools.partial(_conv_kernel, tap_offsets=tap_offsets, q=Q,
                             apply_relu=relu)

    flops = 2 * B * Q * Cin * Cout * KH * KW
    bytes_accessed = 4 * (B * Npad * Cin + KH * KW * Cin * Cout
                          + B * Q * Cout + 2 * Cout)

    out_dense = pl.pallas_call(
        kern,
        out_shape=jax.ShapeDtypeStruct((B, Q, Cout), x.dtype),
        grid=grid,
        in_specs=[
            pl.BlockSpec((1, Npad, Cin), lambda bi, j: (bi, 0, 0)),
            pl.BlockSpec((KH * KW, Cin, TC), lambda bi, j: (0, 0, j)),
            pl.BlockSpec((1, TC), lambda bi, j: (0, j)),
            pl.BlockSpec((1, TC), lambda bi, j: (0, j)),
        ],
        out_specs=pl.BlockSpec((1, Q, TC), lambda bi, j: (bi, 0, j)),
        compiler_params=pltpu.CompilerParams(
            dimension_semantics=("parallel", "arbitrary")),
        cost_estimate=pl.CostEstimate(flops=flops, transcendentals=0,
                                      bytes_accessed=bytes_accessed),
    )(x_flat, w_taps, scale, shift)

    # Unflatten: crop junk columns, apply stride, back to NCHW.
    out = out_dense.reshape(B, OHd, Wp, Cout)[:, :, :OWd, :]
    if stride > 1:
        out = out[:, ::stride, ::stride, :]
    return jnp.transpose(out, (0, 3, 1, 2))


def conv2d_ref(x, w, b, *, stride=1, padding=1, relu=True, bn=None, eps=1e-3):
    """Pure-JAX reference matching the PyTorch module."""
    out = lax.conv_general_dilated(
        x, w, window_strides=(stride, stride),
        padding=((padding, padding), (padding, padding)),
        dimension_numbers=("NCHW", "OIHW", "NCHW"),
        precision=lax.Precision.HIGHEST)
    out = out + b.reshape(1, -1, 1, 1)
    if bn is not None:
        gamma, beta, mean, var = bn
        out = (gamma.reshape(1, -1, 1, 1) * (out - mean.reshape(1, -1, 1, 1))
               / jnp.sqrt(var.reshape(1, -1, 1, 1) + eps)
               + beta.reshape(1, -1, 1, 1))
    if relu:
        out = jnp.maximum(out, 0.0)
    return out


if __name__ == "__main__":
    # Module defaults: relu=True, bn=False.  VGG-style 3x3, padding=1, stride=1.
    B, Cin, Cout, H, W = 2, 4, 8, 16, 16
    K, padding, stride = 3, 1, 1

    key = jax.random.PRNGKey(0)
    kx, kw, kb = jax.random.split(key, 3)
    x = jax.random.normal(kx, (B, Cin, H, W), dtype=jnp.float32)
    w = jax.random.normal(kw, (Cout, Cin, K, K), dtype=jnp.float32) * 0.1
    b = jax.random.normal(kb, (Cout,), dtype=jnp.float32) * 0.1

    out = conv2d_forward(x, w, b, stride=stride, padding=padding,
                         relu=True, bn=None)
    out = jax.block_until_ready(out)

    ref = conv2d_ref(x, w, b, stride=stride, padding=padding, relu=True, bn=None)
    assert out.shape == ref.shape == (B, Cout, H, W)
    assert jnp.allclose(out, ref, atol=1e-3, rtol=1e-3), "mismatch vs reference"

    print("KERNEL_OK")
</pallas_src>

<mosaic_0001>
module attributes {stable_mosaic.version = 11 : i64} {
  func.func @_conv_kernel(%arg0: i32, %arg1: i32, %arg2: memref<1x326x4xf32, #tpu.memory_space<vmem>>, %arg3: memref<9x4x8xf32, #tpu.memory_space<vmem>>, %arg4: memref<1x8xf32, #tpu.memory_space<vmem>>, %arg5: memref<1x8xf32, #tpu.memory_space<vmem>>, %arg6: memref<1x288x8xf32, #tpu.memory_space<vmem>>) attributes {dimension_semantics = [#tpu.dimension_semantics<parallel>, #tpu.dimension_semantics<arbitrary>], iteration_bounds = array<i64: 2, 1>, scalar_prefetch = 0 : i64, scratch_operands = 0 : i64, tpu.core_type = #tpu.core_type<tc>, window_params = [{transform_indices = @transform_0, window_bounds = array<i64: 1, 326, 4>}, {transform_indices = @transform_1, window_bounds = array<i64: 9, 4, 8>}, {transform_indices = @transform_2, window_bounds = array<i64: 1, 8>}, {transform_indices = @transform_3, window_bounds = array<i64: 1, 8>}, {transform_indices = @transform_4, window_bounds = array<i64: 1, 288, 8>}]} {
    %cst = arith.constant 0.000000e+00 : f32
    %0 = vector.broadcast %cst : f32 to vector<288x8xf32>
    %c0 = arith.constant 0 : index
    %c0_0 = arith.constant 0 : index
    %c0_1 = arith.constant 0 : index
    %1 = vector.load %arg2[%c0, %c0_0, %c0_1] : memref<1x326x4xf32, #tpu.memory_space<vmem>>, vector<1x288x4xf32>
    %2 = vector.shape_cast %1 : vector<1x288x4xf32> to vector<288x4xf32>
    %c0_2 = arith.constant 0 : index
    %c0_3 = arith.constant 0 : index
    %c0_4 = arith.constant 0 : index
    %3 = vector.load %arg3[%c0_2, %c0_3, %c0_4] : memref<9x4x8xf32, #tpu.memory_space<vmem>>, vector<1x4x8xf32>
    %4 = vector.shape_cast %3 : vector<1x4x8xf32> to vector<4x8xf32>
    %cst_5 = arith.constant dense<0.000000e+00> : vector<288x8xf32>
    %5 = tpu.matmul %2, %4, %cst_5 {dimension_numbers = #tpu.dot_dimension_numbers<[1], [0], [0], [1], [0, 0, 1, 1], [], []>} : vector<288x4xf32>, vector<4x8xf32>, vector<288x8xf32> -> vector<288x8xf32>
    %6 = arith.addf %0, %5 : vector<288x8xf32>
    %c0_6 = arith.constant 0 : index
    %c1 = arith.constant 1 : index
    %c0_7 = arith.constant 0 : index
    %7 = vector.load %arg2[%c0_6, %c1, %c0_7] : memref<1x326x4xf32, #tpu.memory_space<vmem>>, vector<1x288x4xf32>
    %8 = vector.shape_cast %7 : vector<1x288x4xf32> to vector<288x4xf32>
    %c1_8 = arith.constant 1 : index
    %c0_9 = arith.constant 0 : index
    %c0_10 = arith.constant 0 : index
    %9 = vector.load %arg3[%c1_8, %c0_9, %c0_10] : memref<9x4x8xf32, #tpu.memory_space<vmem>>, vector<1x4x8xf32>
    %10 = vector.shape_cast %9 : vector<1x4x8xf32> to vector<4x8xf32>
    %cst_11 = arith.constant dense<0.000000e+00> : vector<288x8xf32>
    %11 = tpu.matmul %8, %10, %cst_11 {dimension_numbers = #tpu.dot_dimension_numbers<[1], [0], [0], [1], [0, 0, 1, 1], [], []>} : vector<288x4xf32>, vector<4x8xf32>, vector<288x8xf32> -> vector<288x8xf32>
    %12 = arith.addf %6, %11 : vector<288x8xf32>
    %c0_12 = arith.constant 0 : index
    %c2 = arith.constant 2 : index
    %c0_13 = arith.constant 0 : index
    %13 = vector.load %arg2[%c0_12, %c2, %c0_13] : memref<1x326x4xf32, #tpu.memory_space<vmem>>, vector<1x288x4xf32>
    %14 = vector.shape_cast %13 : vector<1x288x4xf32> to vector<288x4xf32>
    %c2_14 = arith.constant 2 : index
    %c0_15 = arith.constant 0 : index
    %c0_16 = arith.constant 0 : index
    %15 = vector.load %arg3[%c2_14, %c0_15, %c0_16] : memref<9x4x8xf32, #tpu.memory_space<vmem>>, vector<1x4x8xf32>
    %16 = vector.shape_cast %15 : vector<1x4x8xf32> to vector<4x8xf32>
    %cst_17 = arith.constant dense<0.000000e+00> : vector<288x8xf32>
    %17 = tpu.matmul %14, %16, %cst_17 {dimension_numbers = #tpu.dot_dimension_numbers<[1], [0], [0], [1], [0, 0, 1, 1], [], []>} : vector<288x4xf32>, vector<4x8xf32>, vector<288x8xf32> -> vector<288x8xf32>
    %18 = arith.addf %12, %17 : vector<288x8xf32>
    %c0_18 = arith.constant 0 : index
    %c18 = arith.constant 18 : index
    %c0_19 = arith.constant 0 : index
    %19 = vector.load %arg2[%c0_18, %c18, %c0_19] : memref<1x326x4xf32, #tpu.memory_space<vmem>>, vector<1x288x4xf32>
    %20 = vector.shape_cast %19 : vector<1x288x4xf32> to vector<288x4xf32>
    %c3 = arith.constant 3 : index
    %c0_20 = arith.constant 0 : index
    %c0_21 = arith.constant 0 : index
    %21 = vector.load %arg3[%c3, %c0_20, %c0_21] : memref<9x4x8xf32, #tpu.memory_space<vmem>>, vector<1x4x8xf32>
    %22 = vector.shape_cast %21 : vector<1x4x8xf32> to vector<4x8xf32>
    %cst_22 = arith.constant dense<0.000000e+00> : vector<288x8xf32>
    %23 = tpu.matmul %20, %22, %cst_22 {dimension_numbers = #tpu.dot_dimension_numbers<[1], [0], [0], [1], [0, 0, 1, 1], [], []>} : vector<288x4xf32>, vector<4x8xf32>, vector<288x8xf32> -> vector<288x8xf32>
    %24 = arith.addf %18, %23 : vector<288x8xf32>
    %c0_23 = arith.constant 0 : index
    %c19 = arith.constant 19 : index
    %c0_24 = arith.constant 0 : index
    %25 = vector.load %arg2[%c0_23, %c19, %c0_24] : memref<1x326x4xf32, #tpu.memory_space<vmem>>, vector<1x288x4xf32>
    %26 = vector.shape_cast %25 : vector<1x288x4xf32> to vector<288x4xf32>
    %c4 = arith.constant 4 : index
    %c0_25 = arith.constant 0 : index
    %c0_26 = arith.constant 0 : index
    %27 = vector.load %arg3[%c4, %c0_25, %c0_26] : memref<9x4x8xf32, #tpu.memory_space<vmem>>, vector<1x4x8xf32>
    %28 = vector.shape_cast %27 : vector<1x4x8xf32> to vector<4x8xf32>
    %cst_27 = arith.constant dense<0.000000e+00> : vector<288x8xf32>
    %29 = tpu.matmul %26, %28, %cst_27 {dimension_numbers = #tpu.dot_dimension_numbers<[1], [0], [0], [1], [0, 0, 1, 1], [], []>} : vector<288x4xf32>, vector<4x8xf32>, vector<288x8xf32> -> vector<288x8xf32>
    %30 = arith.addf %24, %29 : vector<288x8xf32>
    %c0_28 = arith.constant 0 : index
    %c20 = arith.constant 20 : index
    %c0_29 = arith.constant 0 : index
    %31 = vector.load %arg2[%c0_28, %c20, %c0_29] : memref<1x326x4xf32, #tpu.memory_space<vmem>>, vector<1x288x4xf32>
    %32 = vector.shape_cast %31 : vector<1x288x4xf32> to vector<288x4xf32>
    %c5 = arith.constant 5 : index
    %c0_30 = arith.constant 0 : index
    %c0_31 = arith.constant 0 : index
    %33 = vector.load %arg3[%c5, %c0_30, %c0_31] : memref<9x4x8xf32, #tpu.memory_space<vmem>>, vector<1x4x8xf32>
    %34 = vector.shape_cast %33 : vector<1x4x8xf32> to vector<4x8xf32>
    %cst_32 = arith.constant dense<0.000000e+00> : vector<288x8xf32>
    %35 = tpu.matmul %32, %34, %cst_32 {dimension_numbers = #tpu.dot_dimension_numbers<[1], [0], [0], [1], [0, 0, 1, 1], [], []>} : vector<288x4xf32>, vector<4x8xf32>, vector<288x8xf32> -> vector<288x8xf32>
    %36 = arith.addf %30, %35 : vector<288x8xf32>
    %c0_33 = arith.constant 0 : index
    %c36 = arith.constant 36 : index
    %c0_34 = arith.constant 0 : index
    %37 = vector.load %arg2[%c0_33, %c36, %c0_34] : memref<1x326x4xf32, #tpu.memory_space<vmem>>, vector<1x288x4xf32>
    %38 = vector.shape_cast %37 : vector<1x288x4xf32> to vector<288x4xf32>
    %c6 = arith.constant 6 : index
    %c0_35 = arith.constant 0 : index
    %c0_36 = arith.constant 0 : index
    %39 = vector.load %arg3[%c6, %c0_35, %c0_36] : memref<9x4x8xf32, #tpu.memory_space<vmem>>, vector<1x4x8xf32>
    %40 = vector.shape_cast %39 : vector<1x4x8xf32> to vector<4x8xf32>
    %cst_37 = arith.constant dense<0.000000e+00> : vector<288x8xf32>
    %41 = tpu.matmul %38, %40, %cst_37 {dimension_numbers = #tpu.dot_dimension_numbers<[1], [0], [0], [1], [0, 0, 1, 1], [], []>} : vector<288x4xf32>, vector<4x8xf32>, vector<288x8xf32> -> vector<288x8xf32>
    %42 = arith.addf %36, %41 : vector<288x8xf32>
    %c0_38 = arith.constant 0 : index
    %c37 = arith.constant 37 : index
    %c0_39 = arith.constant 0 : index
    %43 = vector.load %arg2[%c0_38, %c37, %c0_39] : memref<1x326x4xf32, #tpu.memory_space<vmem>>, vector<1x288x4xf32>
    %44 = vector.shape_cast %43 : vector<1x288x4xf32> to vector<288x4xf32>
    %c7 = arith.constant 7 : index
    %c0_40 = arith.constant 0 : index
    %c0_41 = arith.constant 0 : index
    %45 = vector.load %arg3[%c7, %c0_40, %c0_41] : memref<9x4x8xf32, #tpu.memory_space<vmem>>, vector<1x4x8xf32>
    %46 = vector.shape_cast %45 : vector<1x4x8xf32> to vector<4x8xf32>
    %cst_42 = arith.constant dense<0.000000e+00> : vector<288x8xf32>
    %47 = tpu.matmul %44, %46, %cst_42 {dimension_numbers = #tpu.dot_dimension_numbers<[1], [0], [0], [1], [0, 0, 1, 1], [], []>} : vector<288x4xf32>, vector<4x8xf32>, vector<288x8xf32> -> vector<288x8xf32>
    %48 = arith.addf %42, %47 : vector<288x8xf32>
    %c0_43 = arith.constant 0 : index
    %c38 = arith.constant 38 : index
    %c0_44 = arith.constant 0 : index
    %49 = vector.load %arg2[%c0_43, %c38, %c0_44] : memref<1x326x4xf32, #tpu.memory_space<vmem>>, vector<1x288x4xf32>
    %50 = vector.shape_cast %49 : vector<1x288x4xf32> to vector<288x4xf32>
    %c8 = arith.constant 8 : index
    %c0_45 = arith.constant 0 : index
    %c0_46 = arith.constant 0 : index
    %51 = vector.load %arg3[%c8, %c0_45, %c0_46] : memref<9x4x8xf32, #tpu.memory_space<vmem>>, vector<1x4x8xf32>
    %52 = vector.shape_cast %51 : vector<1x4x8xf32> to vector<4x8xf32>
    %cst_47 = arith.constant dense<0.000000e+00> : vector<288x8xf32>
    %53 = tpu.matmul %50, %52, %cst_47 {dimension_numbers = #tpu.dot_dimension_numbers<[1], [0], [0], [1], [0, 0, 1, 1], [], []>} : vector<288x4xf32>, vector<4x8xf32>, vector<288x8xf32> -> vector<288x8xf32>
    %54 = arith.addf %48, %53 : vector<288x8xf32>
    %c0_48 = arith.constant 0 : index
    %c0_49 = arith.constant 0 : index
    %55 = vector.load %arg4[%c0_48, %c0_49] : memref<1x8xf32, #tpu.memory_space<vmem>>, vector<1x8xf32>
    %56 = vector.broadcast %55 : vector<1x8xf32> to vector<288x8xf32>
    %57 = arith.mulf %54, %56 : vector<288x8xf32>
    %c0_50 = arith.constant 0 : index
    %c0_51 = arith.constant 0 : index
    %58 = vector.load %arg5[%c0_50, %c0_51] : memref<1x8xf32, #tpu.memory_space<vmem>>, vector<1x8xf32>
    %59 = vector.broadcast %58 : vector<1x8xf32> to vector<288x8xf32>
    %60 = arith.addf %57, %59 : vector<288x8xf32>
    %cst_52 = arith.constant 0.000000e+00 : f32
    %61 = vector.broadcast %cst_52 : f32 to vector<288x8xf32>
    %62 = arith.maximumf %60, %61 : vector<288x8xf32>
    %c0_53 = arith.constant 0 : index
    %c0_54 = arith.constant 0 : index
    %c0_55 = arith.constant 0 : index
    %63 = vector.load %arg6[%c0_53, %c0_54, %c0_55] : memref<1x288x8xf32, #tpu.memory_space<vmem>>, vector<1x288x8xf32>
    %64 = vector.shape_cast %63 : vector<1x288x8xf32> to vector<288x8xf32>
    %65 = vector.shape_cast %62 : vector<288x8xf32> to vector<1x288x8xf32>
    tpu.vector_store %arg6[%c0_53, %c0_54, %c0_55], %65 {strides = array<i32>} : memref<1x288x8xf32, #tpu.memory_space<vmem>>, vector<1x288x8xf32>,
    return
  }
  func.func @transform_0(%arg0: i32, %arg1: i32) -> (i32, i32, i32) {
    %c0_i32 = arith.constant 0 : i32
    %c0_i32_0 = arith.constant 0 : i32
    %c0_i32_1 = arith.constant 0 : i32
    return %arg0, %c0_i32, %c0_i32_0 : i32, i32, i32
  }
  func.func @transform_1(%arg0: i32, %arg1: i32) -> (i32, i32, i32) {
    %c0_i32 = arith.constant 0 : i32
    %c0_i32_0 = arith.constant 0 : i32
    %c0_i32_1 = arith.constant 0 : i32
    return %c0_i32, %c0_i32_0, %arg1 : i32, i32, i32
  }
  func.func @transform_2(%arg0: i32, %arg1: i32) -> (i32, i32) {
    %c0_i32 = arith.constant 0 : i32
    %c0_i32_0 = arith.constant 0 : i32
    return %c0_i32, %arg1 : i32, i32
  }
  func.func @transform_3(%arg0: i32, %arg1: i32) -> (i32, i32) {
    %c0_i32 = arith.constant 0 : i32
    %c0_i32_0 = arith.constant 0 : i32
    return %c0_i32, %arg1 : i32, i32
  }
  func.func @transform_4(%arg0: i32, %arg1: i32) -> (i32, i32, i32) {
    %c0_i32 = arith.constant 0 : i32
    %c0_i32_0 = arith.constant 0 : i32
    return %arg0, %c0_i32, %arg1 : i32, i32, i32
  }
}

</mosaic_0001>

<bundles_post_ra>
// kernel: tpu_custom_call.1
= control target key start
LH: loop header
LB: loop body
LE: loop exit
PB: predicated region body
PF: predicated region fallthrough
CT: control target
= control target key end

     0   :  { %s5607_s15 = smov 0   ;;  %s5609_s16 = smov 0   ;;  %s7021_s0 = inlined_call_operand.vmem [shape: f32[2,326,4], index: 0, kind: input, shape index: {}]   ;;  %s7022_s1 = inlined_call_operand.vmem [shape: f32[9,4,8], index: 1, kind: input, shape index: {}]   ;;  %s7023_s2 = inlined_call_operand.vmem [shape: f32[1,8], index: 2, kind: input, shape index: {}]   ;;  %s7024_s3 = inlined_call_operand.vmem [shape: f32[1,8], index: 3, kind: input, shape index: {}]   ;;  %s7025_s4 = inlined_call_operand.vmem [shape: f32[2,288,8], index: 4, kind: output, shape index: {}]  }
   0x1   :  { %s5611_s17 = smov 0  }
   0x2 LB: > { %s26_s18 = sadd.s32 1, %s5576_s16  ;;  %p4345_p0 = scmp.ge.s32.totalorder %s5580_s17, 1  ;;  %s5580_s17 = sphi %s5611_s17, %s14_s17   ;;  %s5576_s16 = sphi %s5609_s16, %s7027_s16   ;;  %s5572_s15 = sphi %s5607_s15, %s7026_s15  }
   0x3   : > { %p28_p1 = scmp.ge.s32.totalorder %s26_s18, 2  ;;  %p201_p2 = scmp.lt.s32.totalorder %s5580_s17, 3 }
   0x5   : > { %s7029_s18 = smov (%p28_p1, %s26_s18), 0  ;;  %p202_p3 = pnand %p4345_p0, %p201_p2 }
   0x6   : > { %p240_p4 = scmp.lt.s32.totalorder (!%p202_p3), %s5572_s15, 1 }
   0x7   : > { %205 = sbr.rel (%p202_p3) target bundleno = 544 (0x220), region = 36 }
   0xc   : > { %v4348_v0 = vld [vmem:[%s7022_s1 + $0x4] sm:$0xf]  ;;  %vm447_vm0 = vcmask 1043456   ;;  %v299_v1 = vld [vmem:[%s7022_s1] sm:$0xf]  ;;  %s7031_s15 = smov (!%p240_p4, %s5572_s15), 1 }
   0xd   : > { %5530 = vmatprep.subr.msk.mxu1 %vm447_vm0, %v4348_v0  ;;  %5026 = vmatprep.subr.msk.mxu0 %vm447_vm0, %v4348_v0  ;;  %v4423_v2 = vld [vmem:[%s7022_s1 + $0x8] sm:$0xf]  ;;  %s5532_s25 = smul.u32 328, %s7031_s15  ;;  %vm338_vm1 = vcmask 31744   ;;  %v5661_v9 = vld [vmem:[%s7022_s1 + $0xc] sm:$0xf] }
   0xe   : > { %5531 = vmatpush3.msk.msra.mxu1 %vm447_vm0, %v4348_v0  ;;  %5027 = vmatpush3.msk.msra.mxu0 %vm447_vm0, %v4348_v0  ;;  %v5666_v10 = vld [vmem:[%s7022_s1 + $0x10] sm:$0xf]  ;;  %v5751_v47 = vld [vmem:[%s7022_s1 + $0x14] sm:$0xf]  ;;  %v5756_v48 = vld [vmem:[%s7022_s1 + $0x18] sm:$0xf] }
   0xf   : > { %5082 = vmatprep.subr.msk.mxu1 %vm447_vm0, %v299_v1  ;;  %5138 = vmatprep.subr.msk.mxu0 %vm447_vm0, %v4423_v2  ;;  %s5646_s28 = scalar_lea.vmem %s7021_s0, %s5532_s25  ;;  %s5533_s21 = smul.u32 288, %s7031_s15  ;;  %vm4184_vm2 = vcmask 64512  }
  0x10   : > { %v300_v3 = vld [vmem:[%s5646_s28 + $0x1] sm:$0xff]  ;;  %v318_v4 = vld [vmem:[%s5646_s28 + $0x91] sm:$0xff]  ;;  %v301_v5 = vld [vmem:[%s5646_s28 + $0x9] sm:$0xff] }
  0x11   : > { %5028 = vmatprep.mubr.msk.f32.mxu0 %vm338_vm1, %v300_v3  ;;  %5055 = vmatprep.mubr.msk.f32.mxu1 %vm338_vm1, %v318_v4  ;;  %v319_v6 = vld [vmem:[%s5646_s28 + $0x99] sm:$0xff]  ;;  %v302_v7 = vld [vmem:[%s5646_s28 + $0x11] sm:$0xff]  ;;  %v320_v8 = vld [vmem:[%s5646_s28 + $0xa1] sm:$0xff]  ;;  %s6837_s25 = scalar_lea.vmem %s7025_s4, %s5533_s21 }
  0x12   : > { %5029 = vmatmul.mubr.msk.f32.vlgmr.msra.gmra.mxu0 %vm338_vm1, %v301_v5  ;;  %5056 = vmatmul.mubr.msk.f32.vlgmr.msra.gmra.mxu1 %vm338_vm1, %v319_v6  ;;  %v303_v11 = vld [vmem:[%s5646_s28 + $0x19] sm:$0xff]  ;;  %v321_v12 = vld [vmem:[%s5646_s28 + $0xa9] sm:$0xff]  ;;  %v304_v13 = vld [vmem:[%s5646_s28 + $0x21] sm:$0xff] }
  0x13   : > { %5083 = vmatpush3.msk.msra.mxu1 %vm447_vm0, %v299_v1  ;;  %5139 = vmatpush3.msk.msra.mxu0 %vm447_vm0, %v4423_v2  ;;  %v322_v14 = vld [vmem:[%s5646_s28 + $0xb1] sm:$0xff]  ;;  %v305_v15 = vld [vmem:[%s5646_s28 + $0x29] sm:$0xff]  ;;  %v323_v16 = vld [vmem:[%s5646_s28 + $0xb9] sm:$0xff] }
  0x14   : > { %5031 = vmatprep.mubr.msk.f32.mxu0 %vm338_vm1, %v302_v7  ;;  %5058 = vmatprep.mubr.msk.f32.mxu1 %vm338_vm1, %v320_v8  ;;  %v306_v17 = vld [vmem:[%s5646_s28 + $0x31] sm:$0xff]  ;;  %v324_v18 = vld [vmem:[%s5646_s28 + $0xc1] sm:$0xff]  ;;  %v307_v19 = vld [vmem:[%s5646_s28 + $0x39] sm:$0xff] }
  0x15   : > { %5194 = vmatprep.subr.msk.mxu1 %vm447_vm0, %v5661_v9  ;;  %5250 = vmatprep.subr.msk.mxu0 %vm447_vm0, %v5666_v10  ;;  %v325_v20 = vld [vmem:[%s5646_s28 + $0xc9] sm:$0xff]  ;;  %v308_v21 = vld [vmem:[%s5646_s28 + $0x41] sm:$0xff]  ;;  %v326_v22 = vld [vmem:[%s5646_s28 + $0xd1] sm:$0xff] }
  0x16   : > { %5032 = vmatmul.mubr.msk.f32.gmra.mxu0 %vm338_vm1, %v303_v11  ;;  %5059 = vmatmul.mubr.msk.f32.gmra.mxu1 %vm338_vm1, %v321_v12  ;;  %v309_v23 = vld [vmem:[%s5646_s28 + $0x49] sm:$0xff]  ;;  %v327_v24 = vld [vmem:[%s5646_s28 + $0xd9] sm:$0xff]  ;;  %v310_v25 = vld [vmem:[%s5646_s28 + $0x51] sm:$0xff] }
  0x17   : > { %5034 = vmatprep.mubr.msk.f32.mxu0 %vm338_vm1, %v304_v13  ;;  %5061 = vmatprep.mubr.msk.f32.mxu1 %vm338_vm1, %v322_v14  ;;  %v328_v26 = vld [vmem:[%s5646_s28 + $0xe1] sm:$0xff]  ;;  %v311_v27 = vld [vmem:[%s5646_s28 + $0x59] sm:$0xff]  ;;  %v329_v28 = vld [vmem:[%s5646_s28 + $0xe9] sm:$0xff] }
  0x18   : > { %v312_v29 = vld [vmem:[%s5646_s28 + $0x61] sm:$0xff]  ;;  %v330_v30 = vld [vmem:[%s5646_s28 + $0xf1] sm:$0xff]  ;;  %v313_v31 = vld [vmem:[%s5646_s28 + $0x69] sm:$0xff] }
  0x19   : > { %v331_v32 = vld [vmem:[%s5646_s28 + $0xf9] sm:$0xff]  ;;  %v314_v33 = vld [vmem:[%s5646_s28 + $0x71] sm:$0xff]  ;;  %v332_v34 = vld [vmem:[%s5646_s28 + $0x101] sm:$0xff] }
  0x1a   : > { %5035 = vmatmul.mubr.msk.f32.gmra.mxu0 %vm338_vm1, %v305_v15  ;;  %5062 = vmatmul.mubr.msk.f32.gmra.mxu1 %vm338_vm1, %v323_v16  ;;  %v315_v35 = vld [vmem:[%s5646_s28 + $0x79] sm:$0xff]  ;;  %v333_v36 = vld [vmem:[%s5646_s28 + $0x109] sm:$0xff]  ;;  %v316_v37 = vld [vmem:[%s5646_s28 + $0x81] sm:$0xff] }
  0x1b   : > { %5037 = vmatprep.mubr.msk.f32.mxu0 %vm338_vm1, %v306_v17  ;;  %5064 = vmatprep.mubr.msk.f32.mxu1 %vm338_vm1, %v324_v18  ;;  %v334_v38 = vld [vmem:[%s5646_s28 + $0x111] sm:$0xff]  ;;  %v317_v39 = vld [vmem:[%s5646_s28 + $0x89] sm:$0xff]  ;;  %v335_v40 = vld [vmem:[%s5646_s28 + $0x119] sm:$0xff] }
  0x1c   : > { %v263_v41 = vld [vmem:[%s5646_s28] sm:$0xff]  ;;  %v264_v43 = vld [vmem:[%s5646_s28 + $0x8] sm:$0xff]  ;;  %v265_v45 = vld [vmem:[%s5646_s28 + $0x10] sm:$0xff] }
  0x1d   : > { %v1052_v42 = vld [vmem:[%s5646_s28 + $0x2] sm:$0xff]  ;;  %v1053_v44 = vld [vmem:[%s5646_s28 + $0xa] sm:$0xff]  ;;  %v5744_v46 = vld [vmem:[%s5646_s28 + $0x12] sm:$0xff] }
  0x1e   : > { %5038 = vmatmul.mubr.msk.f32.gmra.mxu0 %vm338_vm1, %v307_v19  ;;  %5065 = vmatmul.mubr.msk.f32.gmra.mxu1 %vm338_vm1, %v325_v20  ;;  %v266_v49 = vld [vmem:[%s5646_s28 + $0x18] sm:$0xff]  ;;  %v267_v51 = vld [vmem:[%s5646_s28 + $0x20] sm:$0xff]  ;;  %v268_v53 = vld [vmem:[%s5646_s28 + $0x28] sm:$0xff] }
  0x1f   : > { %5040 = vmatprep.mubr.msk.f32.mxu0 %vm338_vm1, %v308_v21  ;;  %5067 = vmatprep.mubr.msk.f32.mxu1 %vm338_vm1, %v326_v22  ;;  %v5764_v50 = vld [vmem:[%s5646_s28 + $0x1a] sm:$0xff]  ;;  %v5771_v52 = vld [vmem:[%s5646_s28 + $0x22] sm:$0xff]  ;;  %v5785_v54 = vld [vmem:[%s5646_s28 + $0x2a] sm:$0xff] }
  0x20   : > { %v269_v55 = vld [vmem:[%s5646_s28 + $0x30] sm:$0xff]  ;;  %v270_v57 = vld [vmem:[%s5646_s28 + $0x38] sm:$0xff]  ;;  %v271_v59 = vld [vmem:[%s5646_s28 + $0x40] sm:$0xff] }
  0x21   : > { %v5789_v56 = vld [vmem:[%s5646_s28 + $0x32] sm:$0xff]  ;;  %v5799_v58 = vld [vmem:[%s5646_s28 + $0x3a] sm:$0xff]  ;;  %v5803_v60 = vld [vmem:[%s5646_s28 + $0x42] sm:$0xff] }
  0x22   : > { %5041 = vmatmul.mubr.msk.f32.gmra.mxu0 %vm338_vm1, %v309_v23  ;;  %5068 = vmatmul.mubr.msk.f32.gmra.mxu1 %vm338_vm1, %v327_v24  ;;  %v272_v61 = vld [vmem:[%s5646_s28 + $0x48] sm:$0xff]  ;;  %v273_v63 = vld [vmem:[%s5646_s28 + $0x50] sm:$0xff]  ;;  %v274_v1 = vld [vmem:[%s5646_s28 + $0x58] sm:$0xff] }
  0x23   : > { %5043 = vmatprep.mubr.msk.f32.mxu0 %vm338_vm1, %v310_v25  ;;  %5070 = vmatprep.mubr.msk.f32.mxu1 %vm338_vm1, %v328_v26  ;;  %v5813_v62 = vld [vmem:[%s5646_s28 + $0x4a] sm:$0xff]  ;;  %v5817_v0 = vld [vmem:[%s5646_s28 + $0x52] sm:$0xff]  ;;  %v5827_v2 = vld [vmem:[%s5646_s28 + $0x5a] sm:$0xff] }
  0x24   : > { %v275_v3 = vld [vmem:[%s5646_s28 + $0x60] sm:$0xff]  ;;  %v276_v5 = vld [vmem:[%s5646_s28 + $0x68] sm:$0xff]  ;;  %v277_v7 = vld [vmem:[%s5646_s28 + $0x70] sm:$0xff] }
  0x25   : > { %v5831_v4 = vld [vmem:[%s5646_s28 + $0x62] sm:$0xff]  ;;  %v5841_v6 = vld [vmem:[%s5646_s28 + $0x6a] sm:$0xff]  ;;  %v5845_v8 = vld [vmem:[%s5646_s28 + $0x72] sm:$0xff] }
  0x26   : > { %5044 = vmatmul.mubr.msk.f32.gmra.mxu0 %vm338_vm1, %v311_v27  ;;  %5071 = vmatmul.mubr.msk.f32.gmra.mxu1 %vm338_vm1, %v329_v28  ;;  %v279_v11 = vld [vmem:[%s5646_s28 + $0x80] sm:$0xff]  ;;  %v280_v13 = vld [vmem:[%s5646_s28 + $0x88] sm:$0xff]  ;;  %v281_v15 = vld [vmem:[%s5646_s28 + $0x90] sm:$0xff] }
  0x27   : > { %5046 = vmatprep.mubr.msk.f32.mxu0 %vm338_vm1, %v312_v29  ;;  %5073 = vmatprep.mubr.msk.f32.mxu1 %vm338_vm1, %v330_v30  ;;  %v5859_v12 = vld [vmem:[%s5646_s28 + $0x82] sm:$0xff]  ;;  %v5869_v14 = vld [vmem:[%s5646_s28 + $0x8a] sm:$0xff]  ;;  %v5873_v16 = vld [vmem:[%s5646_s28 + $0x92] sm:$0xff] }
  0x28   : > { %v282_v17 = vld [vmem:[%s5646_s28 + $0x98] sm:$0xff]  ;;  %v283_v19 = vld [vmem:[%s5646_s28 + $0xa0] sm:$0xff]  ;;  %v284_v21 = vld [vmem:[%s5646_s28 + $0xa8] sm:$0xff] }
  0x29   : > { %v5883_v18 = vld [vmem:[%s5646_s28 + $0x9a] sm:$0xff]  ;;  %v5887_v20 = vld [vmem:[%s5646_s28 + $0xa2] sm:$0xff]  ;;  %v5897_v22 = vld [vmem:[%s5646_s28 + $0xaa] sm:$0xff] }
  0x2a   : > { %5047 = vmatmul.mubr.msk.f32.gmra.mxu0 %vm338_vm1, %v313_v31  ;;  %5074 = vmatmul.mubr.msk.f32.gmra.mxu1 %vm338_vm1, %v331_v32  ;;  %v285_v23 = vld [vmem:[%s5646_s28 + $0xb0] sm:$0xff]  ;;  %v286_v25 = vld [vmem:[%s5646_s28 + $0xb8] sm:$0xff]  ;;  %v287_v27 = vld [vmem:[%s5646_s28 + $0xc0] sm:$0xff] }
  0x2b   : > { %5049 = vmatprep.mubr.msk.f32.mxu0 %vm338_vm1, %v314_v33  ;;  %5076 = vmatprep.mubr.msk.f32.mxu1 %vm338_vm1, %v332_v34  ;;  %v5901_v24 = vld [vmem:[%s5646_s28 + $0xb2] sm:$0xff]  ;;  %v5911_v26 = vld [vmem:[%s5646_s28 + $0xba] sm:$0xff]  ;;  %v5915_v28 = vld [vmem:[%s5646_s28 + $0xc2] sm:$0xff] }
  0x2c   : > { %v288_v29 = vld [vmem:[%s5646_s28 + $0xc8] sm:$0xff]  ;;  %v289_v31 = vld [vmem:[%s5646_s28 + $0xd0] sm:$0xff]  ;;  %v290_v33 = vld [vmem:[%s5646_s28 + $0xd8] sm:$0xff] }
  0x2d   : > { %v5925_v30 = vld [vmem:[%s5646_s28 + $0xca] sm:$0xff]  ;;  %v5929_v32 = vld [vmem:[%s5646_s28 + $0xd2] sm:$0xff]  ;;  %v5939_v34 = vld [vmem:[%s5646_s28 + $0xda] sm:$0xff] }
  0x2e   : > { %5050 = vmatmul.mubr.msk.f32.gmra.mxu0 %vm338_vm1, %v315_v35  ;;  %5077 = vmatmul.mubr.msk.f32.gmra.mxu1 %vm338_vm1, %v333_v36  ;;  %v291_v35 = vld [vmem:[%s5646_s28 + $0xe0] sm:$0xff] }
  0x2f   : > { %5052 = vmatprep.mubr.msk.f32.mxu0 %vm338_vm1, %v316_v37  ;;  %5079 = vmatprep.mubr.msk.f32.mxu1 %vm338_vm1, %v334_v38  ;;  %v5943_v36 = vld [vmem:[%s5646_s28 + $0xe2] sm:$0xff]  ;;  %v5953_v38 = vld [vmem:[%s5646_s28 + $0xea] sm:$0xff] }
  0x30   : > { %v292_v37 = vld [vmem:[%s5646_s28 + $0xe8] sm:$0xff] }
  0x32   : > { %5053 = vmatmul.mubr.msk.f32.gmra.mxu0 %vm338_vm1, %v317_v39  ;;  %5080 = vmatmul.mubr.msk.f32.gmra.mxu1 %vm338_vm1, %v335_v40  ;;  %v293_v39 = vld [vmem:[%s5646_s28 + $0xf0] sm:$0xff] }
  0x33   : > { %5084 = vmatprep.mubr.msk.f32.mxu1 %vm338_vm1, %v263_v41  ;;  %5140 = vmatprep.mubr.msk.f32.mxu0 %vm338_vm1, %v1052_v42  ;;  %v5957_v40 = vld [vmem:[%s5646_s28 + $0xf2] sm:$0xff]  ;;  %v5967_v42 = vld [vmem:[%s5646_s28 + $0xfa] sm:$0xff] }
  0x34   : > { %v294_v41 = vld [vmem:[%s5646_s28 + $0xf8] sm:$0xff] }
  0x36   : > { %5085 = vmatmul.mubr.msk.f32.vlgmr.msra.gmra.mxu1 %vm338_vm1, %v264_v43  ;;  %5141 = vmatmul.mubr.msk.f32.vlgmr.msra.gmra.mxu0 %vm338_vm1, %v1053_v44  ;;  %v295_v43 = vld [vmem:[%s5646_s28 + $0x100] sm:$0xff] }
  0x37   : > { %5195 = vmatpush3.msk.msra.mxu1 %vm447_vm0, %v5661_v9  ;;  %5251 = vmatpush3.msk.msra.mxu0 %vm447_vm0, %v5666_v10  ;;  %v278_v9 = vld [vmem:[%s5646_s28 + $0x78] sm:$0xff]  ;;  %v5971_v44 = vld [vmem:[%s5646_s28 + $0x102] sm:$0xff] }
  0x38   : > { %5087 = vmatprep.mubr.msk.f32.mxu1 %vm338_vm1, %v265_v45  ;;  %5143 = vmatprep.mubr.msk.f32.mxu0 %vm338_vm1, %v5744_v46  ;;  %v5855_v10 = vld [vmem:[%s5646_s28 + $0x7a] sm:$0xff]  ;;  %v296_v45 = vld [vmem:[%s5646_s28 + $0x108] sm:$0xff] }
  0x39   : > { %5306 = vmatprep.subr.msk.mxu1 %vm447_vm0, %v5751_v47  ;;  %5362 = vmatprep.subr.msk.mxu0 %vm447_vm0, %v5756_v48 }
  0x3a   : > { %5088 = vmatmul.mubr.msk.f32.gmra.mxu1 %vm338_vm1, %v266_v49  ;;  %5144 = vmatmul.mubr.msk.f32.gmra.mxu0 %vm338_vm1, %v5764_v50  ;;  %v5981_v49 = vld [vmem:[%s5646_s28 + $0x10a] sm:$0xff] }
  0x3b   : > { %5090 = vmatprep.mubr.msk.f32.mxu1 %vm338_vm1, %v267_v51  ;;  %5146 = vmatprep.mubr.msk.f32.mxu0 %vm338_vm1, %v5771_v52  ;;  %v297_v51 = vld [vmem:[%s5646_s28 + $0x110] sm:$0xff] }
  0x3e   : > { %5091 = vmatmul.mubr.msk.f32.gmra.mxu1 %vm338_vm1, %v268_v53  ;;  %5147 = vmatmul.mubr.msk.f32.gmra.mxu0 %vm338_vm1, %v5785_v54  ;;  %v5985_v53 = vld [vmem:[%s5646_s28 + $0x112] sm:$0xff] }
  0x3f   : > { %5093 = vmatprep.mubr.msk.f32.mxu1 %vm338_vm1, %v269_v55  ;;  %5149 = vmatprep.mubr.msk.f32.mxu0 %vm338_vm1, %v5789_v56  ;;  %v298_v55 = vld [vmem:[%s5646_s28 + $0x118] sm:$0xff] }
  0x42   : > { %5094 = vmatmul.mubr.msk.f32.gmra.mxu1 %vm338_vm1, %v270_v57  ;;  %5150 = vmatmul.mubr.msk.f32.gmra.mxu0 %vm338_vm1, %v5799_v58  ;;  %v5995_v57 = vld [vmem:[%s5646_s28 + $0x11a] sm:$0xff] }
  0x43   : > { %5096 = vmatprep.mubr.msk.f32.mxu1 %vm338_vm1, %v271_v59  ;;  %5152 = vmatprep.mubr.msk.f32.mxu0 %vm338_vm1, %v5803_v60  ;;  %v1912_v59 = vld [vmem:[%s5646_s28 + $0x13] sm:$0xff] }
  0x46   : > { %5097 = vmatmul.mubr.msk.f32.gmra.mxu1 %vm338_vm1, %v272_v61  ;;  %5153 = vmatmul.mubr.msk.f32.gmra.mxu0 %vm338_vm1, %v5813_v62  ;;  %v1913_v61 = vld [vmem:[%s5646_s28 + $0x1b] sm:$0xff] }
  0x47   : > { %5099 = vmatprep.mubr.msk.f32.mxu1 %vm338_vm1, %v273_v63  ;;  %5155 = vmatprep.mubr.msk.f32.mxu0 %vm338_vm1, %v5817_v0  ;;  %v1914_v63 = vld [vmem:[%s5646_s28 + $0x23] sm:$0xff] }
  0x4a   : > { %5100 = vmatmul.mubr.msk.f32.gmra.mxu1 %vm338_vm1, %v274_v1  ;;  %5156 = vmatmul.mubr.msk.f32.gmra.mxu0 %vm338_vm1, %v5827_v2  ;;  %v6012_v1 = vld [vmem:[%s7022_s1 + $0x1c] sm:$0xf] }
  0x4b   : > { %5102 = vmatprep.mubr.msk.f32.mxu1 %vm338_vm1, %v275_v3  ;;  %5158 = vmatprep.mubr.msk.f32.mxu0 %vm338_vm1, %v5831_v4  ;;  %v1916_v3 = vld [vmem:[%s5646_s28 + $0x33] sm:$0xff] }
  0x4e   : > { %5103 = vmatmul.mubr.msk.f32.gmra.mxu1 %vm338_vm1, %v276_v5  ;;  %5159 = vmatmul.mubr.msk.f32.gmra.mxu0 %vm338_vm1, %v5841_v6  ;;  %v1928_v5 = vld [vmem:[%s5646_s28 + $0x93] sm:$0xff] }
  0x4f   : > { %5105 = vmatprep.mubr.msk.f32.mxu1 %vm338_vm1, %v277_v7  ;;  %5161 = vmatprep.mubr.msk.f32.mxu0 %vm338_vm1, %v5845_v8  ;;  %v1930_v7 = vld [vmem:[%s5646_s28 + $0xa3] sm:$0xff] }
  0x52   : > { %5106 = vmatmul.mubr.msk.f32.gmra.mxu1 %vm338_vm1, %v278_v9  ;;  %5162 = vmatmul.mubr.msk.f32.gmra.mxu0 %vm338_vm1, %v5855_v10  ;;  %v1932_v9 = vld [vmem:[%s5646_s28 + $0xb3] sm:$0xff] }
  0x53   : > { %5108 = vmatprep.mubr.msk.f32.mxu1 %vm338_vm1, %v279_v11  ;;  %5164 = vmatprep.mubr.msk.f32.mxu0 %vm338_vm1, %v5859_v12  ;;  %v1934_v11 = vld [vmem:[%s5646_s28 + $0xc3] sm:$0xff] }
  0x56   : > { %5109 = vmatmul.mubr.msk.f32.gmra.mxu1 %vm338_vm1, %v280_v13  ;;  %5165 = vmatmul.mubr.msk.f32.gmra.mxu0 %vm338_vm1, %v5869_v14  ;;  %v1936_v13 = vld [vmem:[%s5646_s28 + $0xd3] sm:$0xff] }
  0x57   : > { %5111 = vmatprep.mubr.msk.f32.mxu1 %vm338_vm1, %v281_v15  ;;  %5167 = vmatprep.mubr.msk.f32.mxu0 %vm338_vm1, %v5873_v16  ;;  %v1938_v15 = vld [vmem:[%s5646_s28 + $0xe3] sm:$0xff] }
  0x5a   : > { %5112 = vmatmul.mubr.msk.f32.gmra.mxu1 %vm338_vm1, %v282_v17  ;;  %5168 = vmatmul.mubr.msk.f32.gmra.mxu0 %vm338_vm1, %v5883_v18  ;;  %v1940_v17 = vld [vmem:[%s5646_s28 + $0xf3] sm:$0xff] }
  0x5b   : > { %5114 = vmatprep.mubr.msk.f32.mxu1 %vm338_vm1, %v283_v19  ;;  %5170 = vmatprep.mubr.msk.f32.mxu0 %vm338_vm1, %v5887_v20  ;;  %v1942_v19 = vld [vmem:[%s5646_s28 + $0x103] sm:$0xff] }
  0x5e   : > { %5115 = vmatmul.mubr.msk.f32.gmra.mxu1 %vm338_vm1, %v284_v21  ;;  %5171 = vmatmul.mubr.msk.f32.gmra.mxu0 %vm338_vm1, %v5897_v22  ;;  %v1944_v21 = vld [vmem:[%s5646_s28 + $0x113] sm:$0xff] }
  0x5f   : > { %5117 = vmatprep.mubr.msk.f32.mxu1 %vm338_vm1, %v285_v23  ;;  %5173 = vmatprep.mubr.msk.f32.mxu0 %vm338_vm1, %v5901_v24  ;;  %v1516_v23 = vld [vmem:[%s5646_s28 + $0x122] sm:$0xff] }
  0x62   : > { %5118 = vmatmul.mubr.msk.f32.gmra.mxu1 %vm338_vm1, %v286_v25  ;;  %5174 = vmatmul.mubr.msk.f32.gmra.mxu0 %vm338_vm1, %v5911_v26  ;;  %v1517_v25 = vld [vmem:[%s5646_s28 + $0x12a] sm:$0xff] }
  0x63   : > { %5120 = vmatprep.mubr.msk.f32.mxu1 %vm338_vm1, %v287_v27  ;;  %5176 = vmatprep.mubr.msk.f32.mxu0 %vm338_vm1, %v5915_v28  ;;  %v2342_v27 = vld [vmem:[%s5646_s28 + $0x14] sm:$0xff] }
  0x66   : > { %5121 = vmatmul.mubr.msk.f32.gmra.mxu1 %vm338_vm1, %v288_v29  ;;  %5177 = vmatmul.mubr.msk.f32.gmra.mxu0 %vm338_vm1, %v5925_v30  ;;  %v2343_v29 = vld [vmem:[%s5646_s28 + $0x1c] sm:$0xff] }
  0x67   : > { %5123 = vmatprep.mubr.msk.f32.mxu1 %vm338_vm1, %v289_v31  ;;  %5179 = vmatprep.mubr.msk.f32.mxu0 %vm338_vm1, %v5929_v32  ;;  %v2774_v31 = vld [vmem:[%s5646_s28 + $0x34] sm:$0xff] }
  0x6a   : > { %5124 = vmatmul.mubr.msk.f32.gmra.mxu1 %vm338_vm1, %v290_v33  ;;  %5180 = vmatmul.mubr.msk.f32.gmra.mxu0 %vm338_vm1, %v5939_v34  ;;  %v2776_v33 = vld [vmem:[%s5646_s28 + $0x44] sm:$0xff] }
  0x6b   : > { %5126 = vmatprep.mubr.msk.f32.mxu1 %vm338_vm1, %v291_v35  ;;  %5182 = vmatprep.mubr.msk.f32.mxu0 %vm338_vm1, %v5943_v36  ;;  %v2778_v35 = vld [vmem:[%s5646_s28 + $0x54] sm:$0xff] }
  0x6e   : > { %5127 = vmatmul.mubr.msk.f32.gmra.mxu1 %vm338_vm1, %v292_v37  ;;  %5183 = vmatmul.mubr.msk.f32.gmra.mxu0 %vm338_vm1, %v5953_v38  ;;  %v2780_v37 = vld [vmem:[%s5646_s28 + $0x64] sm:$0xff] }
  0x6f   : > { %5129 = vmatprep.mubr.msk.f32.mxu1 %vm338_vm1, %v293_v39  ;;  %5185 = vmatprep.mubr.msk.f32.mxu0 %vm338_vm1, %v5957_v40 }
  0x72   : > { %5130 = vmatmul.mubr.msk.f32.gmra.mxu1 %vm338_vm1, %v294_v41  ;;  %5186 = vmatmul.mubr.msk.f32.gmra.mxu0 %vm338_vm1, %v5967_v42 }
  0x73   : > { %5132 = vmatprep.mubr.msk.f32.mxu1 %vm338_vm1, %v295_v43  ;;  %5188 = vmatprep.mubr.msk.f32.mxu0 %vm338_vm1, %v5971_v44  ;;  %v2782_v43 = vld [vmem:[%s5646_s28 + $0x74] sm:$0xff] }
  0x76   : > { %5133 = vmatmul.mubr.msk.f32.gmra.mxu1 %vm338_vm1, %v296_v45  ;;  %5189 = vmatmul.mubr.msk.f32.gmra.mxu0 %vm338_vm1, %v5981_v49 }
  0x77   : > { %5135 = vmatprep.mubr.msk.f32.mxu1 %vm338_vm1, %v297_v51  ;;  %5191 = vmatprep.mubr.msk.f32.mxu0 %vm338_vm1, %v5985_v53 }
  0x7a   : > { %5136 = vmatmul.mubr.msk.f32.gmra.mxu1 %vm338_vm1, %v298_v55  ;;  %5192 = vmatmul.mubr.msk.f32.gmra.mxu0 %vm338_vm1, %v5995_v57  ;;  %v2784_v55 = vld [vmem:[%s5646_s28 + $0x84] sm:$0xff] }
  0x7b   : > { %5196 = vmatprep.mubr.msk.f32.mxu1 %vm338_vm1, %v5744_v46  ;;  %5252 = vmatprep.mubr.msk.f32.mxu0 %vm338_vm1, %v1912_v59  ;;  %v6017_v46 = vld [vmem:[%s7022_s1 + $0x20] sm:$0xf] }
  0x7e   : > { %5197 = vmatmul.mubr.msk.f32.vlgmr.msra.gmra.mxu1 %vm338_vm1, %v5764_v50  ;;  %5253 = vmatmul.mubr.msk.f32.vlgmr.msra.gmra.mxu0 %vm338_vm1, %v1913_v61  ;;  %v1915_v50 = vld [vmem:[%s5646_s28 + $0x2b] sm:$0xff] }
  0x7f   : > { %5307 = vmatpush3.msk.msra.mxu1 %vm447_vm0, %v5751_v47  ;;  %5363 = vmatpush3.msk.msra.mxu0 %vm447_vm0, %v5756_v48  ;;  %v1917_v47 = vld [vmem:[%s5646_s28 + $0x3b] sm:$0xff]  ;;  %v1918_v48 = vld [vmem:[%s5646_s28 + $0x43] sm:$0xff]  ;;  %v2785_v61 = vld [vmem:[%s5646_s28 + $0x8c] sm:$0xff] }
  0x80   : > { %5199 = vmatprep.mubr.msk.f32.mxu1 %vm338_vm1, %v5771_v52  ;;  %5255 = vmatprep.mubr.msk.f32.mxu0 %vm338_vm1, %v1914_v63  ;;  %v1919_v52 = vld [vmem:[%s5646_s28 + $0x4b] sm:$0xff] }
  0x81   : > { %5418 = vmatprep.subr.msk.mxu1 %vm447_vm0, %v6012_v1  ;;  %5474 = vmatprep.subr.msk.mxu0 %vm447_vm0, %v6017_v46 }
  0x82   : > { %5200 = vmatmul.mubr.msk.f32.gmra.mxu1 %vm338_vm1, %v5785_v54  ;;  %5256 = vmatmul.mubr.msk.f32.gmra.mxu0 %vm338_vm1, %v1915_v50  ;;  %v1920_v54 = vld [vmem:[%s5646_s28 + $0x53] sm:$0xff] }
  0x83   : > { %5202 = vmatprep.mubr.msk.f32.mxu1 %vm338_vm1, %v5789_v56  ;;  %5258 = vmatprep.mubr.msk.f32.mxu0 %vm338_vm1, %v1916_v3  ;;  %v1921_v56 = vld [vmem:[%s5646_s28 + $0x5b] sm:$0xff] }
  0x86   : > { %5203 = vmatmul.mubr.msk.f32.gmra.mxu1 %vm338_vm1, %v5799_v58  ;;  %5259 = vmatmul.mubr.msk.f32.gmra.mxu0 %vm338_vm1, %v1917_v47  ;;  %v1922_v58 = vld [vmem:[%s5646_s28 + $0x63] sm:$0xff] }
  0x87   : > { %5205 = vmatprep.mubr.msk.f32.mxu1 %vm338_vm1, %v5803_v60  ;;  %5261 = vmatprep.mubr.msk.f32.mxu0 %vm338_vm1, %v1918_v48  ;;  %v1923_v60 = vld [vmem:[%s5646_s28 + $0x6b] sm:$0xff]  ;;  %v2787_v47 = vld [vmem:[%s5646_s28 + $0x9c] sm:$0xff] }
  0x8a   : > { %5206 = vmatmul.mubr.msk.f32.gmra.mxu1 %vm338_vm1, %v5813_v62  ;;  %5262 = vmatmul.mubr.msk.f32.gmra.mxu0 %vm338_vm1, %v1919_v52  ;;  %v1924_v62 = vld [vmem:[%s5646_s28 + $0x73] sm:$0xff] }
  0x8b   : > { %5208 = vmatprep.mubr.msk.f32.mxu1 %vm338_vm1, %v5817_v0  ;;  %5264 = vmatprep.mubr.msk.f32.mxu0 %vm338_vm1, %v1920_v54  ;;  %v1925_v0 = vld [vmem:[%s5646_s28 + $0x7b] sm:$0xff]  ;;  %v2788_v54 = vld [vmem:[%s5646_s28 + $0xa4] sm:$0xff] }
  0x8e   : > { %5209 = vmatmul.mubr.msk.f32.gmra.mxu1 %vm338_vm1, %v5827_v2  ;;  %5265 = vmatmul.mubr.msk.f32.gmra.mxu0 %vm338_vm1, %v1921_v56  ;;  %v1926_v2 = vld [vmem:[%s5646_s28 + $0x83] sm:$0xff] }
  0x8f   : > { %5211 = vmatprep.mubr.msk.f32.mxu1 %vm338_vm1, %v5831_v4  ;;  %5267 = vmatprep.mubr.msk.f32.mxu0 %vm338_vm1, %v1922_v58  ;;  %v1927_v4 = vld [vmem:[%s5646_s28 + $0x8b] sm:$0xff] }
  0x92   : > { %5212 = vmatmul.mubr.msk.f32.gmra.mxu1 %vm338_vm1, %v5841_v6  ;;  %5268 = vmatmul.mubr.msk.f32.gmra.mxu0 %vm338_vm1, %v1923_v60  ;;  %v1929_v6 = vld [vmem:[%s5646_s28 + $0x9b] sm:$0xff]  ;;  %v2789_v60 = vld [vmem:[%s5646_s28 + $0xac] sm:$0xff] }
  0x93   : > { %5214 = vmatprep.mubr.msk.f32.mxu1 %vm338_vm1, %v5845_v8  ;;  %5270 = vmatprep.mubr.msk.f32.mxu0 %vm338_vm1, %v1924_v62  ;;  %v1931_v8 = vld [vmem:[%s5646_s28 + $0xab] sm:$0xff] }
  0x96   : > { %5215 = vmatmul.mubr.msk.f32.gmra.mxu1 %vm338_vm1, %v5855_v10  ;;  %5271 = vmatmul.mubr.msk.f32.gmra.mxu0 %vm338_vm1, %v1925_v0  ;;  %v1933_v10 = vld [vmem:[%s5646_s28 + $0xbb] sm:$0xff] }
  0x97   : > { %5217 = vmatprep.mubr.msk.f32.mxu1 %vm338_vm1, %v5859_v12  ;;  %5273 = vmatprep.mubr.msk.f32.mxu0 %vm338_vm1, %v1926_v2  ;;  %v1935_v12 = vld [vmem:[%s5646_s28 + $0xcb] sm:$0xff]  ;;  %v2790_v2 = vld [vmem:[%s5646_s28 + $0xb4] sm:$0xff] }
  0x9a   : > { %5218 = vmatmul.mubr.msk.f32.gmra.mxu1 %vm338_vm1, %v5869_v14  ;;  %5274 = vmatmul.mubr.msk.f32.gmra.mxu0 %vm338_vm1, %v1927_v4  ;;  %v1937_v14 = vld [vmem:[%s5646_s28 + $0xdb] sm:$0xff] }
  0x9b   : > { %5220 = vmatprep.mubr.msk.f32.mxu1 %vm338_vm1, %v5873_v16  ;;  %5276 = vmatprep.mubr.msk.f32.mxu0 %vm338_vm1, %v1928_v5  ;;  %v1939_v16 = vld [vmem:[%s5646_s28 + $0xeb] sm:$0xff] }
  0x9e   : > { %5221 = vmatmul.mubr.msk.f32.gmra.mxu1 %vm338_vm1, %v5883_v18  ;;  %5277 = vmatmul.mubr.msk.f32.gmra.mxu0 %vm338_vm1, %v1929_v6  ;;  %v1941_v18 = vld [vmem:[%s5646_s28 + $0xfb] sm:$0xff] }
  0x9f   : > { %5223 = vmatprep.mubr.msk.f32.mxu1 %vm338_vm1, %v5887_v20  ;;  %5279 = vmatprep.mubr.msk.f32.mxu0 %vm338_vm1, %v1930_v7  ;;  %v1943_v20 = vld [vmem:[%s5646_s28 + $0x10b] sm:$0xff]  ;;  %v2791_v6 = vld [vmem:[%s5646_s28 + $0xbc] sm:$0xff] }
  0xa2   : > { %5224 = vmatmul.mubr.msk.f32.gmra.mxu1 %vm338_vm1, %v5897_v22  ;;  %5280 = vmatmul.mubr.msk.f32.gmra.mxu0 %vm338_vm1, %v1931_v8  ;;  %v1945_v22 = vld [vmem:[%s5646_s28 + $0x11b] sm:$0xff] }
  0xa3   : > { %5226 = vmatprep.mubr.msk.f32.mxu1 %vm338_vm1, %v5901_v24  ;;  %5282 = vmatprep.mubr.msk.f32.mxu0 %vm338_vm1, %v1932_v9  ;;  %v1946_v24 = vld [vmem:[%s5646_s28 + $0x123] sm:$0xff] }
  0xa4   : > { %v2792_v9 = vld [vmem:[%s5646_s28 + $0xc4] sm:$0xff] }
  0xa6   : > { %5227 = vmatmul.mubr.msk.f32.gmra.mxu1 %vm338_vm1, %v5911_v26  ;;  %5283 = vmatmul.mubr.msk.f32.gmra.mxu0 %vm338_vm1, %v1933_v10  ;;  %v1947_v26 = vld [vmem:[%s5646_s28 + $0x12b] sm:$0xff] }
  0xa7   : > { %5229 = vmatprep.mubr.msk.f32.mxu1 %vm338_vm1, %v5915_v28  ;;  %5285 = vmatprep.mubr.msk.f32.mxu0 %vm338_vm1, %v1934_v11  ;;  %v2772_v28 = vld [vmem:[%s5646_s28 + $0x24] sm:$0xff] }
  0xaa   : > { %5230 = vmatmul.mubr.msk.f32.gmra.mxu1 %vm338_vm1, %v5925_v30  ;;  %5286 = vmatmul.mubr.msk.f32.gmra.mxu0 %vm338_vm1, %v1935_v12  ;;  %v2773_v30 = vld [vmem:[%s5646_s28 + $0x2c] sm:$0xff] }
  0xab   : > { %5232 = vmatprep.mubr.msk.f32.mxu1 %vm338_vm1, %v5929_v32  ;;  %5288 = vmatprep.mubr.msk.f32.mxu0 %vm338_vm1, %v1936_v13  ;;  %v2775_v32 = vld [vmem:[%s5646_s28 + $0x3c] sm:$0xff]  ;;  %v2793_v12 = vld [vmem:[%s5646_s28 + $0xcc] sm:$0xff] }
  0xae   : > { %5233 = vmatmul.mubr.msk.f32.gmra.mxu1 %vm338_vm1, %v5939_v34  ;;  %5289 = vmatmul.mubr.msk.f32.gmra.mxu0 %vm338_vm1, %v1937_v14  ;;  %v2777_v34 = vld [vmem:[%s5646_s28 + $0x4c] sm:$0xff] }
  0xaf   : > { %5235 = vmatprep.mubr.msk.f32.mxu1 %vm338_vm1, %v5943_v36  ;;  %5291 = vmatprep.mubr.msk.f32.mxu0 %vm338_vm1, %v1938_v15  ;;  %v2779_v36 = vld [vmem:[%s5646_s28 + $0x5c] sm:$0xff]  ;;  %v2794_v15 = vld [vmem:[%s5646_s28 + $0xd4] sm:$0xff] }
  0xb2   : > { %5236 = vmatmul.mubr.msk.f32.gmra.mxu1 %vm338_vm1, %v5953_v38  ;;  %5292 = vmatmul.mubr.msk.f32.gmra.mxu0 %vm338_vm1, %v1939_v16 }
  0xb3   : > { %5238 = vmatprep.mubr.msk.f32.mxu1 %vm338_vm1, %v5957_v40  ;;  %5294 = vmatprep.mubr.msk.f32.mxu0 %vm338_vm1, %v1940_v17  ;;  %v2781_v40 = vld [vmem:[%s5646_s28 + $0x6c] sm:$0xff] }
  0xb6   : > { %5239 = vmatmul.mubr.msk.f32.gmra.mxu1 %vm338_vm1, %v5967_v42  ;;  %5295 = vmatmul.mubr.msk.f32.gmra.mxu0 %vm338_vm1, %v1941_v18  ;;  %v2795_v18 = vld [vmem:[%s5646_s28 + $0xdc] sm:$0xff] }
  0xb7   : > { %5241 = vmatprep.mubr.msk.f32.mxu1 %vm338_vm1, %v5971_v44  ;;  %5297 = vmatprep.mubr.msk.f32.mxu0 %vm338_vm1, %v1942_v19 }
  0xba   : > { %5242 = vmatmul.mubr.msk.f32.gmra.mxu1 %vm338_vm1, %v5981_v49  ;;  %5298 = vmatmul.mubr.msk.f32.gmra.mxu0 %vm338_vm1, %v1943_v20  ;;  %v2783_v49 = vld [vmem:[%s5646_s28 + $0x7c] sm:$0xff] }
  0xbb   : > { %5244 = vmatprep.mubr.msk.f32.mxu1 %vm338_vm1, %v5985_v53  ;;  %5300 = vmatprep.mubr.msk.f32.mxu0 %vm338_vm1, %v1944_v21  ;;  %v2796_v21 = vld [vmem:[%s5646_s28 + $0xe4] sm:$0xff] }
  0xbe   : > { %5245 = vmatmul.mubr.msk.f32.gmra.mxu1 %vm338_vm1, %v5995_v57  ;;  %5301 = vmatmul.mubr.msk.f32.gmra.mxu0 %vm338_vm1, %v1945_v22 }
  0xbf   : > { %5247 = vmatprep.mubr.msk.f32.mxu1 %vm338_vm1, %v1516_v23  ;;  %5303 = vmatprep.mubr.msk.f32.mxu0 %vm338_vm1, %v1946_v24  ;;  %v2797_v24 = vld [vmem:[%s5646_s28 + $0xec] sm:$0xff] }
  0xc2   : > { %5248 = vmatmul.mubr.msk.f32.gmra.mxu1 %vm338_vm1, %v1517_v25  ;;  %5304 = vmatmul.mubr.msk.f32.gmra.mxu0 %vm338_vm1, %v1947_v26 }
  0xc3   : > { %5308 = vmatprep.mubr.msk.f32.mxu1 %vm338_vm1, %v2342_v27  ;;  %5364 = vmatprep.mubr.msk.f32.mxu0 %vm338_vm1, %v2772_v28  ;;  %v2798_v27 = vld [vmem:[%s5646_s28 + $0xf4] sm:$0xff] }
  0xc6   : > { %5309 = vmatmul.mubr.msk.f32.vlgmr.msra.gmra.mxu1 %vm338_vm1, %v2343_v29  ;;  %5365 = vmatmul.mubr.msk.f32.vlgmr.msra.gmra.mxu0 %vm338_vm1, %v2773_v30 }
  0xc7   : > { %5419 = vmatpush3.msk.msra.mxu1 %vm447_vm0, %v6012_v1  ;;  %5475 = vmatpush3.msk.msra.mxu0 %vm447_vm0, %v6017_v46  ;;  %v2786_v46 = vld [vmem:[%s5646_s28 + $0x94] sm:$0xff] }
  0xc8   : > { %5311 = vmatprep.mubr.msk.f32.mxu1 %vm338_vm1, %v2772_v28  ;;  %5367 = vmatprep.mubr.msk.f32.mxu0 %vm338_vm1, %v2774_v31 }
  0xca   : > { %5312 = vmatmul.mubr.msk.f32.gmra.mxu1 %vm338_vm1, %v2773_v30  ;;  %5368 = vmatmul.mubr.msk.f32.gmra.mxu0 %vm338_vm1, %v2775_v32 }
  0xcb   : > { %5314 = vmatprep.mubr.msk.f32.mxu1 %vm338_vm1, %v2774_v31  ;;  %5370 = vmatprep.mubr.msk.f32.mxu0 %vm338_vm1, %v2776_v33  ;;  %v2799_v31 = vld [vmem:[%s5646_s28 + $0xfc] sm:$0xff] }
  0xce   : > { %5315 = vmatmul.mubr.msk.f32.gmra.mxu1 %vm338_vm1, %v2775_v32  ;;  %5371 = vmatmul.mubr.msk.f32.gmra.mxu0 %vm338_vm1, %v2777_v34 }
  0xcf   : > { %5317 = vmatprep.mubr.msk.f32.mxu1 %vm338_vm1, %v2776_v33  ;;  %5373 = vmatprep.mubr.msk.f32.mxu0 %vm338_vm1, %v2778_v35 }
  0xd2   : > { %v6191_v38 = vpop.f32.mrf.mxu0  ;;  %v6193_v39 = vpop.f32.mrf.mxu1  ;;  %5318 = vmatmul.mubr.msk.f32.gmra.mxu1 %vm338_vm1, %v2777_v34  ;;  %5374 = vmatmul.mubr.msk.f32.gmra.mxu0 %vm338_vm1, %v2779_v36  ;;  %v2800_v34 = vld [vmem:[%s5646_s28 + $0x104] sm:$0xff] }
  0xd3   : > { %5320 = vmatprep.mubr.msk.f32.mxu1 %vm338_vm1, %v2778_v35  ;;  %5376 = vmatprep.mubr.msk.f32.mxu0 %vm338_vm1, %v2780_v37 }
  0xd4   : > { %v6200_v41 = vpop.f32.mrf.mxu0  ;;  %v6202_v42 = vpop.f32.mrf.mxu1 }
  0xd6   : > { %v6205_v44 = vpop.f32.mrf.mxu0  ;;  %v6207_v45 = vpop.f32.mrf.mxu1  ;;  %5321 = vmatmul.mubr.msk.f32.gmra.mxu1 %vm338_vm1, %v2779_v36  ;;  %5377 = vmatmul.mubr.msk.f32.gmra.mxu0 %vm338_vm1, %v2781_v40 }
  0xd7   : > { %5323 = vmatprep.mubr.msk.f32.mxu1 %vm338_vm1, %v2780_v37  ;;  %5379 = vmatprep.mubr.msk.f32.mxu0 %vm338_vm1, %v2782_v43 }
  0xd8   : > { %v6214_v51 = vpop.f32.mrf.mxu0  ;;  %v6216_v53 = vpop.f32.mrf.mxu1 }
  0xda   : > { %v6219_v57 = vpop.f32.mrf.mxu0  ;;  %v6221_v59 = vpop.f32.mrf.mxu1  ;;  %5324 = vmatmul.mubr.msk.f32.gmra.mxu1 %vm338_vm1, %v2781_v40  ;;  %5380 = vmatmul.mubr.msk.f32.gmra.mxu0 %vm338_vm1, %v2783_v49 }
  0xdb   : > { %5326 = vmatprep.mubr.msk.f32.mxu1 %vm338_vm1, %v2782_v43  ;;  %5382 = vmatprep.mubr.msk.f32.mxu0 %vm338_vm1, %v2784_v55 }
  0xdc   : > { %v6228_v63 = vpop.f32.mrf.mxu0  ;;  %v6230_v1 = vpop.f32.mrf.mxu1 }
  0xde   : > { %v6233_v50 = vpop.f32.mrf.mxu0  ;;  %v6235_v3 = vpop.f32.mrf.mxu1  ;;  %5327 = vmatmul.mubr.msk.f32.gmra.mxu1 %vm338_vm1, %v2783_v49  ;;  %5383 = vmatmul.mubr.msk.f32.gmra.mxu0 %vm338_vm1, %v2785_v61  ;;  %v2801_v49 = vld [vmem:[%s5646_s28 + $0x10c] sm:$0xff] }
  0xdf   : > { %5329 = vmatprep.mubr.msk.f32.mxu1 %vm338_vm1, %v2784_v55  ;;  %5385 = vmatprep.mubr.msk.f32.mxu0 %vm338_vm1, %v2786_v46 }
  0xe0   : > { %v6242_v48 = vpop.f32.mrf.mxu0  ;;  %v6244_v52 = vpop.f32.mrf.mxu1 }
  0xe2   : > { %v6247_v56 = vpop.f32.mrf.mxu0  ;;  %v6249_v58 = vpop.f32.mrf.mxu1  ;;  %5330 = vmatmul.mubr.msk.f32.gmra.mxu1 %vm338_vm1, %v2785_v61  ;;  %5386 = vmatmul.mubr.msk.f32.gmra.mxu0 %vm338_vm1, %v2787_v47 }
  0xe3   : > { %5332 = vmatprep.mubr.msk.f32.mxu1 %vm338_vm1, %v2786_v46  ;;  %5388 = vmatprep.mubr.msk.f32.mxu0 %vm338_vm1, %v2788_v54 }
  0xe4   : > { %v6256_v62 = vpop.f32.mrf.mxu0  ;;  %v6258_v0 = vpop.f32.mrf.mxu1 }
  0xe6   : > { %v6261_v4 = vpop.f32.mrf.mxu0  ;;  %v6263_v5 = vpop.f32.mrf.mxu1  ;;  %5333 = vmatmul.mubr.msk.f32.gmra.mxu1 %vm338_vm1, %v2787_v47  ;;  %5389 = vmatmul.mubr.msk.f32.gmra.mxu0 %vm338_vm1, %v2789_v60 }
  0xe7   : > { %5335 = vmatprep.mubr.msk.f32.mxu1 %vm338_vm1, %v2788_v54  ;;  %5391 = vmatprep.mubr.msk.f32.mxu0 %vm338_vm1, %v2790_v2 }
  0xe8   : > { %v6270_v7 = vpop.f32.mrf.mxu0  ;;  %v6272_v8 = vpop.f32.mrf.mxu1 }
  0xea   : > { %v6275_v10 = vpop.f32.mrf.mxu0  ;;  %v6277_v11 = vpop.f32.mrf.mxu1  ;;  %5336 = vmatmul.mubr.msk.f32.gmra.mxu1 %vm338_vm1, %v2789_v60  ;;  %5392 = vmatmul.mubr.msk.f32.gmra.mxu0 %vm338_vm1, %v2791_v6 }
  0xeb   : > { %5338 = vmatprep.mubr.msk.f32.mxu1 %vm338_vm1, %v2790_v2  ;;  %5394 = vmatprep.mubr.msk.f32.mxu0 %vm338_vm1, %v2792_v9 }
  0xec   : > { %v6284_v13 = vpop.f32.mrf.mxu0  ;;  %v6286_v14 = vpop.f32.mrf.mxu1 }
  0xee   : > { %v6289_v16 = vpop.f32.mrf.mxu0  ;;  %v6291_v17 = vpop.f32.mrf.mxu1  ;;  %5339 = vmatmul.mubr.msk.f32.gmra.mxu1 %vm338_vm1, %v2791_v6  ;;  %5395 = vmatmul.mubr.msk.f32.gmra.mxu0 %vm338_vm1, %v2793_v12  ;;  %v2803_v6 = vld [vmem:[%s5646_s28 + $0x11c] sm:$0xff] }
  0xef   : > { %5341 = vmatprep.mubr.msk.f32.mxu1 %vm338_vm1, %v2792_v9  ;;  %5397 = vmatprep.mubr.msk.f32.mxu0 %vm338_vm1, %v2794_v15 }
  0xf0   : > { %v6298_v19 = vpop.f32.mrf.mxu0  ;;  %v6300_v20 = vpop.f32.mrf.mxu1 }
  0xf2   : > { %v6303_v22 = vpop.f32.mrf.mxu0  ;;  %v6305_v23 = vpop.f32.mrf.mxu1  ;;  %5342 = vmatmul.mubr.msk.f32.gmra.mxu1 %vm338_vm1, %v2793_v12  ;;  %5398 = vmatmul.mubr.msk.f32.gmra.mxu0 %vm338_vm1, %v2795_v18 }
  0xf3   : > { %5344 = vmatprep.mubr.msk.f32.mxu1 %vm338_vm1, %v2794_v15  ;;  %5400 = vmatprep.mubr.msk.f32.mxu0 %vm338_vm1, %v2796_v21 }
  0xf4   : > { %v6312_v25 = vpop.f32.mrf.mxu0  ;;  %v6314_v26 = vpop.f32.mrf.mxu1 }
  0xf6   : > { %v5086_v28 = vpop.f32.mrf.mxu1  ;;  %v5142_v29 = vpop.f32.mrf.mxu0  ;;  %5345 = vmatmul.mubr.msk.f32.gmra.mxu1 %vm338_vm1, %v2795_v18  ;;  %5401 = vmatmul.mubr.msk.f32.gmra.mxu0 %vm338_vm1, %v2797_v24 }
  0xf7   : > { %v879_v30 = vadd.f32 %v5086_v28, %v6191_v38  ;;  %5347 = vmatprep.mubr.msk.f32.mxu1 %vm338_vm1, %v2796_v21  ;;  %5403 = vmatprep.mubr.msk.f32.mxu0 %vm338_vm1, %v2798_v27  ;;  %v2805_v28 = vld [vmem:[%s5646_s28 + $0x12c] sm:$0xff] }
  0xf8   : > { %v873_v32 = vpop.f32.mrf.mxu1  ;;  %v1267_v33 = vpop.f32.mrf.mxu0 }
  0xf9   : > { %v6324_v35 = vadd.f32 %v5142_v29, %v879_v30  ;;  %v874_v36 = vadd.f32 %v873_v32, %v6200_v41  ;;  %v2802_v41 = vld [vmem:[%s5646_s28 + $0x114] sm:$0xff] }
  0xfa   : > { %v5089_v37 = vpop.f32.mrf.mxu1  ;;  %v5145_v40 = vpop.f32.mrf.mxu0  ;;  %5348 = vmatmul.mubr.msk.f32.gmra.mxu1 %vm338_vm1, %v2797_v24  ;;  %5404 = vmatmul.mubr.msk.f32.gmra.mxu0 %vm338_vm1, %v2799_v31 }
  0xfb   : > { %v6329_v38 = vadd.f32 %v1267_v33, %v874_v36  ;;  %v889_v43 = vadd.f32 %v5089_v37, %v6205_v44  ;;  %5350 = vmatprep.mubr.msk.f32.mxu1 %vm338_vm1, %v2798_v27  ;;  %5406 = vmatprep.mubr.msk.f32.mxu0 %vm338_vm1, %v2800_v34  ;;  %v2807_v37 = vld [vmem:[%s5646_s28 + $0x13c] sm:$0xff] }
  0xfc   : > { %v883_v55 = vpop.f32.mrf.mxu1  ;;  %v1277_v61 = vpop.f32.mrf.mxu0 }
  0xfd   : > { %v6336_v46 = vadd.f32 %v5145_v40, %v889_v43  ;;  %v884_v47 = vadd.f32 %v883_v55, %v6214_v51  ;;  %v2804_v51 = vld [vmem:[%s5646_s28 + $0x124] sm:$0xff] }
  0xfe   : > { %v5092_v54 = vpop.f32.mrf.mxu1  ;;  %v5148_v60 = vpop.f32.mrf.mxu0  ;;  %5351 = vmatmul.mubr.msk.f32.gmra.mxu1 %vm338_vm1, %v2799_v31  ;;  %5407 = vmatmul.mubr.msk.f32.gmra.mxu0 %vm338_vm1, %v2801_v49 }
  0xff   : > { %v6341_v44 = vadd.f32 %v1277_v61, %v884_v47  ;;  %v899_v2 = vadd.f32 %v5092_v54, %v6219_v57  ;;  %5353 = vmatprep.mubr.msk.f32.mxu1 %vm338_vm1, %v2800_v34  ;;  %5409 = vmatprep.mubr.msk.f32.mxu0 %vm338_vm1, %v2802_v41 }
 0x100   : > { %v893_v9 = vpop.f32.mrf.mxu1  ;;  %v1287_v12 = vpop.f32.mrf.mxu0 }
 0x101   : > { %v6348_v15 = vadd.f32 %v5148_v60, %v899_v2  ;;  %v894_v18 = vadd.f32 %v893_v9, %v6228_v63  ;;  %v2806_v63 = vld [vmem:[%s5646_s28 + $0x134] sm:$0xff] }
 0x102   : > { %v5095_v21 = vpop.f32.mrf.mxu1  ;;  %v5151_v24 = vpop.f32.mrf.mxu0  ;;  %5354 = vmatmul.mubr.msk.f32.gmra.mxu1 %vm338_vm1, %v2801_v49  ;;  %5410 = vmatmul.mubr.msk.f32.gmra.mxu0 %vm338_vm1, %v2803_v6  ;;  %v3632_v49 = vld [vmem:[%s5646_s28 + $0x26] sm:$0xff]  ;;  %v3633_v2 = vld [vmem:[%s5646_s28 + $0x2e] sm:$0xff] }
 0x103   : > { %v6353_v57 = vadd.f32 %v1287_v12, %v894_v18  ;;  %v909_v27 = vadd.f32 %v5095_v21, %v6233_v50  ;;  %5356 = vmatprep.mubr.msk.f32.mxu1 %vm338_vm1, %v2802_v41  ;;  %5412 = vmatprep.mubr.msk.f32.mxu0 %vm338_vm1, %v2804_v51  ;;  %v3203_v60 = vld [vmem:[%s5646_s28 + $0x2d] sm:$0xff]  ;;  %v3204_v9 = vld [vmem:[%s5646_s28 + $0x35] sm:$0xff] }
 0x104   : > { %v903_v29 = vpop.f32.mrf.mxu1  ;;  %v1297_v30 = vpop.f32.mrf.mxu0  ;;  %v3634_v12 = vld [vmem:[%s5646_s28 + $0x36] sm:$0xff] }
 0x105   : > { %v6360_v31 = vadd.f32 %v5151_v24, %v909_v27  ;;  %v904_v32 = vadd.f32 %v903_v29, %v6242_v48  ;;  %v3202_v48 = vld [vmem:[%s5646_s28 + $0x25] sm:$0xff] }
 0x106   : > { %v5098_v33 = vpop.f32.mrf.mxu1  ;;  %v5154_v34 = vpop.f32.mrf.mxu0  ;;  %5357 = vmatmul.mubr.msk.f32.gmra.mxu1 %vm338_vm1, %v2803_v6  ;;  %5413 = vmatmul.mubr.msk.f32.gmra.mxu0 %vm338_vm1, %v2805_v28  ;;  %v3635_v29 = vld [vmem:[%s5646_s28 + $0x3e] sm:$0xff] }
 0x107   : > { %v6365_v50 = vadd.f32 %v1297_v30, %v904_v32  ;;  %v919_v36 = vadd.f32 %v5098_v33, %v6247_v56  ;;  %5359 = vmatprep.mubr.msk.f32.mxu1 %vm338_vm1, %v2804_v51  ;;  %5415 = vmatprep.mubr.msk.f32.mxu0 %vm338_vm1, %v2806_v63  ;;  %v3206_v63 = vld [vmem:[%s5646_s28 + $0x45] sm:$0xff] }
 0x108   : > { %v913_v40 = vpop.f32.mrf.mxu1  ;;  %v1307_v43 = vpop.f32.mrf.mxu0  ;;  %v3636_v32 = vld [vmem:[%s5646_s28 + $0x46] sm:$0xff] }
 0x109   : > { %v6373_v55 = vadd.f32 %v5154_v34, %v919_v36  ;;  %v914_v61 = vadd.f32 %v913_v40, %v6256_v62 }
 0x10a   : > { %v5101_v41 = vpop.f32.mrf.mxu1  ;;  %v5157_v47 = vpop.f32.mrf.mxu0  ;;  %5360 = vmatmul.mubr.msk.f32.gmra.mxu1 %vm338_vm1, %v2805_v28  ;;  %5416 = vmatmul.mubr.msk.f32.gmra.mxu0 %vm338_vm1, %v2807_v37  ;;  %v3205_v28 = vld [vmem:[%s5646_s28 + $0x3d] sm:$0xff] }
 0x10b   : > { %v6378_v56 = vadd.f32 %v1307_v43, %v914_v61  ;;  %v929_v54 = vadd.f32 %v5101_v41, %v6261_v4  ;;  %5420 = vmatprep.mubr.msk.f32.mxu1 %vm338_vm1, %v3202_v48  ;;  %5476 = vmatprep.mubr.msk.f32.mxu0 %vm338_vm1, %v3632_v49  ;;  %v3207_v43 = vld [vmem:[%s5646_s28 + $0x4d] sm:$0xff]  ;;  %v3208_v61 = vld [vmem:[%s5646_s28 + $0x55] sm:$0xff] }
 0x10c   : > { %v923_v6 = vpop.f32.mrf.mxu1  ;;  %v1317_v62 = vpop.f32.mrf.mxu0  ;;  %v3637_v48 = vld [vmem:[%s5646_s28 + $0x4e] sm:$0xff]  ;;  %v3638_v41 = vld [vmem:[%s5646_s28 + $0x56] sm:$0xff] }
 0x10d   : > { %v6387_v51 = vadd.f32 %v5157_v47, %v929_v54  ;;  %v924_v18 = vadd.f32 %v923_v6, %v6270_v7 }
 0x10e   : > { %v5104_v21 = vpop.f32.mrf.mxu1  ;;  %v5160_v4 = vpop.f32.mrf.mxu0  ;;  %5421 = vmatmul.mubr.msk.f32.vlgmr.msra.gmra.mxu1 %vm338_vm1, %v3203_v60  ;;  %5477 = vmatmul.mubr.msk.f32.vlgmr.msra.gmra.mxu0 %vm338_vm1, %v3633_v2 }
 0x10f   : > { %v6392_v24 = vadd.f32 %v1317_v62, %v924_v18  ;;  %v939_v27 = vadd.f32 %v5104_v21, %v6275_v10  ;;  %5423 = vmatprep.mubr.msk.f32.mxu1 %vm338_vm1, %v3204_v9  ;;  %5479 = vmatprep.mubr.msk.f32.mxu0 %vm338_vm1, %v3634_v12  ;;  %v3209_v62 = vld [vmem:[%s5646_s28 + $0x5d] sm:$0xff]  ;;  %v3210_v18 = vld [vmem:[%s5646_s28 + $0x65] sm:$0xff] }
 0x110   : > { %v933_v30 = vpop.f32.mrf.mxu1  ;;  %v1327_v7 = vpop.f32.mrf.mxu0  ;;  %v3639_v9 = vld [vmem:[%s5646_s28 + $0x5e] sm:$0xff]  ;;  %v3640_v21 = vld [vmem:[%s5646_s28 + $0x66] sm:$0xff] }
 0x111   : > { %v6401_v33 = vadd.f32 %v5160_v4, %v939_v27  ;;  %v934_v34 = vadd.f32 %v933_v30, %v6284_v13 }
 0x112   : > { %v5107_v36 = vpop.f32.mrf.mxu1  ;;  %v5163_v10 = vpop.f32.mrf.mxu0  ;;  %5424 = vmatmul.mubr.msk.f32.gmra.mxu1 %vm338_vm1, %v3205_v28  ;;  %5480 = vmatmul.mubr.msk.f32.gmra.mxu0 %vm338_vm1, %v3635_v29 }
 0x113   : > { %v6406_v37 = vadd.f32 %v1327_v7, %v934_v34  ;;  %v949_v40 = vadd.f32 %v5107_v36, %v6289_v16  ;;  %5426 = vmatprep.mubr.msk.f32.mxu1 %vm338_vm1, %v3206_v63  ;;  %5482 = vmatprep.mubr.msk.f32.mxu0 %vm338_vm1, %v3636_v32  ;;  %v3211_v7 = vld [vmem:[%s5646_s28 + $0x6d] sm:$0xff]  ;;  %v3212_v34 = vld [vmem:[%s5646_s28 + $0x75] sm:$0xff] }
 0x114   : > { %v943_v49 = vpop.f32.mrf.mxu1  ;;  %v1337_v13 = vpop.f32.mrf.mxu0  ;;  %v3641_v63 = vld [vmem:[%s5646_s28 + $0x6e] sm:$0xff]  ;;  %v3642_v36 = vld [vmem:[%s5646_s28 + $0x76] sm:$0xff] }
 0x115   : > { %v6415_v47 = vadd.f32 %v5163_v10, %v949_v40  ;;  %v944_v54 = vadd.f32 %v943_v49, %v6298_v19 }
 0x116   : > { %v5110_v60 = vpop.f32.mrf.mxu1  ;;  %v5166_v16 = vpop.f32.mrf.mxu0  ;;  %5427 = vmatmul.mubr.msk.f32.gmra.mxu1 %vm338_vm1, %v3207_v43  ;;  %5483 = vmatmul.mubr.msk.f32.gmra.mxu0 %vm338_vm1, %v3637_v48 }
 0x117   : > { %v6420_v2 = vadd.f32 %v1337_v13, %v944_v54  ;;  %v959_v6 = vadd.f32 %v5110_v60, %v6303_v22  ;;  %5429 = vmatprep.mubr.msk.f32.mxu1 %vm338_vm1, %v3208_v61  ;;  %5485 = vmatprep.mubr.msk.f32.mxu0 %vm338_vm1, %v3638_v41  ;;  %v3213_v13 = vld [vmem:[%s5646_s28 + $0x7d] sm:$0xff]  ;;  %v3214_v54 = vld [vmem:[%s5646_s28 + $0x85] sm:$0xff] }
 0x118   : > { %v953_v12 = vpop.f32.mrf.mxu1  ;;  %v1347_v19 = vpop.f32.mrf.mxu0  ;;  %v3643_v61 = vld [vmem:[%s5646_s28 + $0x7e] sm:$0xff]  ;;  %v3644_v60 = vld [vmem:[%s5646_s28 + $0x86] sm:$0xff] }
 0x119   : > { %v6429_v4 = vadd.f32 %v5166_v16, %v959_v6  ;;  %v954_v27 = vadd.f32 %v953_v12, %v6312_v25 }
 0x11a   : > { %v5113_v28 = vpop.f32.mrf.mxu1  ;;  %v5169_v22 = vpop.f32.mrf.mxu0  ;;  %5430 = vmatmul.mubr.msk.f32.gmra.mxu1 %vm338_vm1, %v3209_v62  ;;  %5486 = vmatmul.mubr.msk.f32.gmra.mxu0 %vm338_vm1, %v3639_v9 }
 0x11b   : > { %v6434_v29 = vadd.f32 %v1347_v19, %v954_v27  ;;  %v969_v30 = vadd.f32 %v5113_v28, %v6193_v39  ;;  %5432 = vmatprep.mubr.msk.f32.mxu1 %vm338_vm1, %v3210_v18  ;;  %5488 = vmatprep.mubr.msk.f32.mxu0 %vm338_vm1, %v3640_v21  ;;  %v3215_v19 = vld [vmem:[%s5646_s28 + $0x8d] sm:$0xff]  ;;  %v3216_v27 = vld [vmem:[%s5646_s28 + $0x95] sm:$0xff] }
 0x11c   : > { %v963_v32 = vpop.f32.mrf.mxu1  ;;  %v1357_v25 = vpop.f32.mrf.mxu0  ;;  %v3645_v18 = vld [vmem:[%s5646_s28 + $0x8e] sm:$0xff]  ;;  %v3646_v28 = vld [vmem:[%s5646_s28 + $0x96] sm:$0xff] }
 0x11d   : > { %v6443_v10 = vadd.f32 %v5169_v22, %v969_v30  ;;  %v964_v40 = vadd.f32 %v963_v32, %v6202_v42 }
 0x11e   : > { %v5116_v43 = vpop.f32.mrf.mxu1  ;;  %v5172_v39 = vpop.f32.mrf.mxu0  ;;  %5433 = vmatmul.mubr.msk.f32.gmra.mxu1 %vm338_vm1, %v3211_v7  ;;  %5489 = vmatmul.mubr.msk.f32.gmra.mxu0 %vm338_vm1, %v3641_v63 }
 0x11f   : > { %v6448_v48 = vadd.f32 %v1357_v25, %v964_v40  ;;  %v979_v49 = vadd.f32 %v5116_v43, %v6207_v45  ;;  %5435 = vmatprep.mubr.msk.f32.mxu1 %vm338_vm1, %v3212_v34  ;;  %5491 = vmatprep.mubr.msk.f32.mxu0 %vm338_vm1, %v3642_v36  ;;  %v3217_v25 = vld [vmem:[%s5646_s28 + $0x9d] sm:$0xff]  ;;  %v3218_v40 = vld [vmem:[%s5646_s28 + $0xa5] sm:$0xff] }
 0x120   : > { %v973_v41 = vpop.f32.mrf.mxu1  ;;  %v1367_v42 = vpop.f32.mrf.mxu0  ;;  %v3647_v34 = vld [vmem:[%s5646_s28 + $0x9e] sm:$0xff]  ;;  %v3648_v43 = vld [vmem:[%s5646_s28 + $0xa6] sm:$0xff] }
 0x121   : > { %v6457_v16 = vadd.f32 %v5172_v39, %v979_v49  ;;  %v974_v6 = vadd.f32 %v973_v41, %v6216_v53 }
 0x122   : > { %v5119_v62 = vpop.f32.mrf.mxu1  ;;  %v5175_v45 = vpop.f32.mrf.mxu0  ;;  %5436 = vmatmul.mubr.msk.f32.gmra.mxu1 %vm338_vm1, %v3213_v13  ;;  %5492 = vmatmul.mubr.msk.f32.gmra.mxu0 %vm338_vm1, %v3643_v61 }
 0x123   : > { %v6462_v9 = vadd.f32 %v1367_v42, %v974_v6  ;;  %v989_v12 = vadd.f32 %v5119_v62, %v6221_v59  ;;  %5438 = vmatprep.mubr.msk.f32.mxu1 %vm338_vm1, %v3214_v54  ;;  %5494 = vmatprep.mubr.msk.f32.mxu0 %vm338_vm1, %v3644_v60  ;;  %v3219_v42 = vld [vmem:[%s5646_s28 + $0xad] sm:$0xff]  ;;  %v3220_v6 = vld [vmem:[%s5646_s28 + $0xb5] sm:$0xff] }
 0x124   : > { %v983_v21 = vpop.f32.mrf.mxu1  ;;  %v1377_v53 = vpop.f32.mrf.mxu0  ;;  %v3649_v54 = vld [vmem:[%s5646_s28 + $0xae] sm:$0xff]  ;;  %v3650_v62 = vld [vmem:[%s5646_s28 + $0xb6] sm:$0xff] }
 0x125   : > { %v6471_v22 = vadd.f32 %v5175_v45, %v989_v12  ;;  %v984_v30 = vadd.f32 %v983_v21, %v6230_v1 }
 0x126   : > { %v5122_v7 = vpop.f32.mrf.mxu1  ;;  %v5178_v59 = vpop.f32.mrf.mxu0  ;;  %5439 = vmatmul.mubr.msk.f32.gmra.mxu1 %vm338_vm1, %v3215_v19  ;;  %5495 = vmatmul.mubr.msk.f32.gmra.mxu0 %vm338_vm1, %v3645_v18 }
 0x127   : > { %v6476_v63 = vadd.f32 %v1377_v53, %v984_v30  ;;  %v999_v32 = vadd.f32 %v5122_v7, %v6235_v3  ;;  %5441 = vmatprep.mubr.msk.f32.mxu1 %vm338_vm1, %v3216_v27  ;;  %5497 = vmatprep.mubr.msk.f32.mxu0 %vm338_vm1, %v3646_v28  ;;  %v3221_v53 = vld [vmem:[%s5646_s28 + $0xbd] sm:$0xff]  ;;  %v3222_v30 = vld [vmem:[%s5646_s28 + $0xc5] sm:$0xff] }
 0x128   : > { %v993_v36 = vpop.f32.mrf.mxu1  ;;  %v1387_v1 = vpop.f32.mrf.mxu0  ;;  %v3651_v27 = vld [vmem:[%s5646_s28 + $0xbe] sm:$0xff]  ;;  %v3652_v7 = vld [vmem:[%s5646_s28 + $0xc6] sm:$0xff] }
 0x129   : > { %v6485_v39 = vadd.f32 %v5178_v59, %v999_v32  ;;  %v994_v49 = vadd.f32 %v993_v36, %v6244_v52 }
 0x12a   : > { %v5125_v13 = vpop.f32.mrf.mxu1  ;;  %v5181_v3 = vpop.f32.mrf.mxu0  ;;  %5442 = vmatmul.mubr.msk.f32.gmra.mxu1 %vm338_vm1, %v3217_v25  ;;  %5498 = vmatmul.mubr.msk.f32.gmra.mxu0 %vm338_vm1, %v3647_v34 }
 0x12b   : > { %v6490_v61 = vadd.f32 %v1387_v1, %v994_v49  ;;  %v1009_v41 = vadd.f32 %v5125_v13, %v6249_v58  ;;  %5444 = vmatprep.mubr.msk.f32.mxu1 %vm338_vm1, %v3218_v40  ;;  %5500 = vmatprep.mubr.msk.f32.mxu0 %vm338_vm1, %v3648_v43  ;;  %v3223_v1 = vld [vmem:[%s5646_s28 + $0xcd] sm:$0xff]  ;;  %v3224_v49 = vld [vmem:[%s5646_s28 + $0xd5] sm:$0xff] }
 0x12c   : > { %v1003_v60 = vpop.f32.mrf.mxu1  ;;  %v1397_v52 = vpop.f32.mrf.mxu0  ;;  %v3653_v40 = vld [vmem:[%s5646_s28 + $0xce] sm:$0xff]  ;;  %v3654_v13 = vld [vmem:[%s5646_s28 + $0xd6] sm:$0xff] }
 0x12d   : > { %v6499_v45 = vadd.f32 %v5181_v3, %v1009_v41  ;;  %v1004_v12 = vadd.f32 %v1003_v60, %v6258_v0 }
 0x12e   : > { %v5128_v19 = vpop.f32.mrf.mxu1  ;;  %v5184_v58 = vpop.f32.mrf.mxu0  ;;  %5445 = vmatmul.mubr.msk.f32.gmra.mxu1 %vm338_vm1, %v3219_v42  ;;  %5501 = vmatmul.mubr.msk.f32.gmra.mxu0 %vm338_vm1, %v3649_v54 }
 0x12f   : > { %v6504_v18 = vadd.f32 %v1397_v52, %v1004_v12  ;;  %v1019_v21 = vadd.f32 %v5128_v19, %v6263_v5  ;;  %5447 = vmatprep.mubr.msk.f32.mxu1 %vm338_vm1, %v3220_v6  ;;  %5503 = vmatprep.mubr.msk.f32.mxu0 %vm338_vm1, %v3650_v62  ;;  %v3225_v52 = vld [vmem:[%s5646_s28 + $0xdd] sm:$0xff]  ;;  %v3226_v12 = vld [vmem:[%s5646_s28 + $0xe5] sm:$0xff] }
 0x130   : > { %v1013_v28 = vpop.f32.mrf.mxu1  ;;  %v1407_v0 = vpop.f32.mrf.mxu0  ;;  %v3655_v6 = vld [vmem:[%s5646_s28 + $0xde] sm:$0xff]  ;;  %v3656_v19 = vld [vmem:[%s5646_s28 + $0xe6] sm:$0xff] }
 0x131   : > { %v6513_v59 = vadd.f32 %v5184_v58, %v1019_v21  ;;  %v1014_v32 = vadd.f32 %v1013_v28, %v6272_v8 }
 0x132   : > { %v5131_v25 = vpop.f32.mrf.mxu1  ;;  %v5187_v5 = vpop.f32.mrf.mxu0  ;;  %5448 = vmatmul.mubr.msk.f32.gmra.mxu1 %vm338_vm1, %v3221_v53  ;;  %5504 = vmatmul.mubr.msk.f32.gmra.mxu0 %vm338_vm1, %v3651_v27 }
 0x133   : > { %v6518_v34 = vadd.f32 %v1407_v0, %v1014_v32  ;;  %v1029_v36 = vadd.f32 %v5131_v25, %v6277_v11  ;;  %5450 = vmatprep.mubr.msk.f32.mxu1 %vm338_vm1, %v3222_v30  ;;  %5506 = vmatprep.mubr.msk.f32.mxu0 %vm338_vm1, %v3652_v7  ;;  %v3227_v0 = vld [vmem:[%s5646_s28 + $0xed] sm:$0xff]  ;;  %v3228_v32 = vld [vmem:[%s5646_s28 + $0xf5] sm:$0xff] }
 0x134   : > { %v1023_v43 = vpop.f32.mrf.mxu1  ;;  %v1417_v8 = vpop.f32.mrf.mxu0  ;;  %v3657_v30 = vld [vmem:[%s5646_s28 + $0xee] sm:$0xff]  ;;  %v3658_v25 = vld [vmem:[%s5646_s28 + $0xf6] sm:$0xff] }
 0x135   : > { %v6527_v3 = vadd.f32 %v5187_v5, %v1029_v36  ;;  %v1024_v41 = vadd.f32 %v1023_v43, %v6286_v14 }
 0x136   : > { %v5134_v42 = vpop.f32.mrf.mxu1  ;;  %v5190_v11 = vpop.f32.mrf.mxu0  ;;  %5451 = vmatmul.mubr.msk.f32.gmra.mxu1 %vm338_vm1, %v3223_v1  ;;  %5507 = vmatmul.mubr.msk.f32.gmra.mxu0 %vm338_vm1, %v3653_v40 }
 0x137   : > { %v6532_v54 = vadd.f32 %v1417_v8, %v1024_v41  ;;  %v1039_v60 = vadd.f32 %v5134_v42, %v6291_v17  ;;  %5453 = vmatprep.mubr.msk.f32.mxu1 %vm338_vm1, %v3224_v49  ;;  %5509 = vmatprep.mubr.msk.f32.mxu0 %vm338_vm1, %v3654_v13  ;;  %v3229_v8 = vld [vmem:[%s5646_s28 + $0xfd] sm:$0xff]  ;;  %v3230_v41 = vld [vmem:[%s5646_s28 + $0x105] sm:$0xff] }
 0x138   : > { %v1033_v62 = vpop.f32.mrf.mxu1  ;;  %v1427_v14 = vpop.f32.mrf.mxu0  ;;  %v3659_v49 = vld [vmem:[%s5646_s28 + $0xfe] sm:$0xff]  ;;  %v3660_v42 = vld [vmem:[%s5646_s28 + $0x106] sm:$0xff] }
 0x139   : > { %v6541_v58 = vadd.f32 %v5190_v11, %v1039_v60  ;;  %v1034_v21 = vadd.f32 %v1033_v62, %v6300_v20 }
 0x13a   : > { %v5137_v53 = vpop.f32.mrf.mxu1  ;;  %v5193_v17 = vpop.f32.mrf.mxu0  ;;  %5454 = vmatmul.mubr.msk.f32.gmra.mxu1 %vm338_vm1, %v3225_v52  ;;  %5510 = vmatmul.mubr.msk.f32.gmra.mxu0 %vm338_vm1, %v3655_v6 }
 0x13b   : > { %v6546_v27 = vadd.f32 %v1427_v14, %v1034_v21  ;;  %v1049_v28 = vadd.f32 %v5137_v53, %v6305_v23  ;;  %5456 = vmatprep.mubr.msk.f32.mxu1 %vm338_vm1, %v3226_v12  ;;  %5512 = vmatprep.mubr.msk.f32.mxu0 %vm338_vm1, %v3656_v19  ;;  %v3231_v14 = vld [vmem:[%s5646_s28 + $0x10d] sm:$0xff]  ;;  %v3232_v21 = vld [vmem:[%s5646_s28 + $0x115] sm:$0xff] }
 0x13c   : > { %v1043_v7 = vpop.f32.mrf.mxu1  ;;  %v1437_v20 = vpop.f32.mrf.mxu0  ;;  %v3661_v12 = vld [vmem:[%s5646_s28 + $0x10e] sm:$0xff]  ;;  %v3662_v53 = vld [vmem:[%s5646_s28 + $0x116] sm:$0xff] }
 0x13d   : > { %v6555_v5 = vadd.f32 %v5193_v17, %v1049_v28  ;;  %v1044_v36 = vadd.f32 %v1043_v7, %v6314_v26 }
 0x13e   : > { %v5198_v1 = vpop.f32.mrf.mxu1  ;;  %v5254_v23 = vpop.f32.mrf.mxu0  ;;  %5457 = vmatmul.mubr.msk.f32.gmra.mxu1 %vm338_vm1, %v3227_v0  ;;  %5513 = vmatmul.mubr.msk.f32.gmra.mxu0 %vm338_vm1, %v3657_v30 }
 0x13f   : > { %v6560_v40 = vadd.f32 %v1437_v20, %v1044_v36  ;;  %v1877_v43 = vadd.f32 %v5198_v1, %v6324_v35  ;;  %5459 = vmatprep.mubr.msk.f32.mxu1 %vm338_vm1, %v3228_v32  ;;  %5515 = vmatprep.mubr.msk.f32.mxu0 %vm338_vm1, %v3658_v25  ;;  %v3233_v20 = vld [vmem:[%s5646_s28 + $0x11d] sm:$0xff]  ;;  %v3234_v36 = vld [vmem:[%s5646_s28 + $0x125] sm:$0xff] }
 0x140   : > { %v1697_v13 = vpop.f32.mrf.mxu1  ;;  %v2127_v26 = vpop.f32.mrf.mxu0  ;;  %v3663_v32 = vld [vmem:[%s5646_s28 + $0x11e] sm:$0xff]  ;;  %v3664_v1 = vld [vmem:[%s5646_s28 + $0x126] sm:$0xff] }
 0x141   : > { %v6569_v11 = vadd.f32 %v5254_v23, %v1877_v43  ;;  %v1876_v60 = vadd.f32 %v1697_v13, %v6329_v38 }
 0x142   : > { %v5201_v52 = vpop.f32.mrf.mxu1  ;;  %v5257_v35 = vpop.f32.mrf.mxu0  ;;  %5460 = vmatmul.mubr.msk.f32.gmra.mxu1 %vm338_vm1, %v3229_v8  ;;  %5516 = vmatmul.mubr.msk.f32.gmra.mxu0 %vm338_vm1, %v3659_v49 }
 0x143   : > { %v6574_v6 = vadd.f32 %v2127_v26, %v1876_v60  ;;  %v1879_v62 = vadd.f32 %v5201_v52, %v6336_v46  ;;  %5462 = vmatprep.mubr.msk.f32.mxu1 %vm338_vm1, %v3230_v41  ;;  %5518 = vmatprep.mubr.msk.f32.mxu0 %vm338_vm1, %v3660_v42  ;;  %v3235_v26 = vld [vmem:[%s5646_s28 + $0x12d] sm:$0xff]  ;;  %v3236_v60 = vld [vmem:[%s5646_s28 + $0x135] sm:$0xff] }
 0x144   : > { %v1707_v19 = vpop.f32.mrf.mxu1  ;;  %v2137_v38 = vpop.f32.mrf.mxu0  ;;  %v3665_v41 = vld [vmem:[%s5646_s28 + $0x12e] sm:$0xff]  ;;  %v3666_v52 = vld [vmem:[%s5646_s28 + $0x136] sm:$0xff] }
 0x145   : > { %v6583_v17 = vadd.f32 %v5257_v35, %v1879_v62  ;;  %v1878_v28 = vadd.f32 %v1707_v19, %v6341_v44 }
 0x146   : > { %v5204_v0 = vpop.f32.mrf.mxu1  ;;  %v5260_v46 = vpop.f32.mrf.mxu0  ;;  %5463 = vmatmul.mubr.msk.f32.gmra.mxu1 %vm338_vm1, %v3231_v14  ;;  %5519 = vmatmul.mubr.msk.f32.gmra.mxu0 %vm338_vm1, %v3661_v12 }
 0x147   : > { %v6588_v30 = vadd.f32 %v2137_v38, %v1878_v28  ;;  %v1881_v7 = vadd.f32 %v5204_v0, %v6348_v15  ;;  %5465 = vmatprep.mubr.msk.f32.mxu1 %vm338_vm1, %v3232_v21  ;;  %5521 = vmatprep.mubr.msk.f32.mxu0 %vm338_vm1, %v3662_v53  ;;  %v3237_v38 = vld [vmem:[%s5646_s28 + $0x13d] sm:$0xff] }
 0x148   : > { %v1717_v25 = vpop.f32.mrf.mxu1  ;;  %v2147_v44 = vpop.f32.mrf.mxu0  ;;  %v3667_v21 = vld [vmem:[%s5646_s28 + $0x13e] sm:$0xff] }
 0x149   : > { %v6597_v23 = vadd.f32 %v5260_v46, %v1881_v7  ;;  %v1880_v43 = vadd.f32 %v1717_v25, %v6353_v57 }
 0x14a   : > { %v5207_v8 = vpop.f32.mrf.mxu1  ;;  %v5263_v15 = vpop.f32.mrf.mxu0  ;;  %5466 = vmatmul.mubr.msk.f32.gmra.mxu1 %vm338_vm1, %v3233_v20  ;;  %5522 = vmatmul.mubr.msk.f32.gmra.mxu0 %vm338_vm1, %v3663_v32 }
 0x14b   : > { %v6602_v49 = vadd.f32 %v2147_v44, %v1880_v43  ;;  %v1883_v13 = vadd.f32 %v5207_v8, %v6360_v31  ;;  %5468 = vmatprep.mubr.msk.f32.mxu1 %vm338_vm1, %v3234_v36  ;;  %5524 = vmatprep.mubr.msk.f32.mxu0 %vm338_vm1, %v3664_v1 }
 0x14c   : > { %v1727_v42 = vpop.f32.mrf.mxu1  ;;  %v2157_v57 = vpop.f32.mrf.mxu0 }
 0x14d   : > { %v6611_v35 = vadd.f32 %v5263_v15, %v1883_v13  ;;  %v1882_v62 = vadd.f32 %v1727_v42, %v6365_v50 }
 0x14e   : > { %v5210_v14 = vpop.f32.mrf.mxu1  ;;  %v5266_v12 = vpop.f32.mrf.mxu0  ;;  %5469 = vmatmul.mubr.msk.f32.gmra.mxu1 %vm338_vm1, %v3235_v26  ;;  %5525 = vmatmul.mubr.msk.f32.gmra.mxu0 %vm338_vm1, %v3665_v41 }
 0x14f   : > { %v6616_v31 = vadd.f32 %v2157_v57, %v1882_v62  ;;  %v1885_v19 = vadd.f32 %v5210_v14, %v6373_v55  ;;  %5471 = vmatprep.mubr.msk.f32.mxu1 %vm338_vm1, %v3236_v60  ;;  %5527 = vmatprep.mubr.msk.f32.mxu0 %vm338_vm1, %v3666_v52 }
 0x150   : > { %v1737_v53 = vpop.f32.mrf.mxu1  ;;  %v2167_v28 = vpop.f32.mrf.mxu0 }
 0x151   : > { %v6623_v0 = vadd.f32 %v5266_v12, %v1885_v19  ;;  %v1884_v50 = vadd.f32 %v1737_v53, %v6378_v56 }
 0x152   : > { %v5213_v46 = vpop.f32.mrf.mxu1  ;;  %v5269_v7 = vpop.f32.mrf.mxu0  ;;  %5472 = vmatmul.mubr.msk.f32.gmra.mxu1 %vm338_vm1, %v3237_v38  ;;  %5528 = vmatmul.mubr.msk.f32.gmra.mxu0 %vm338_vm1, %v3667_v21 }
 0x153   : > { %v6628_v20 = vadd.f32 %v2167_v28, %v1884_v50  ;;  %v1887_v55 = vadd.f32 %v5213_v46, %v6387_v51 }
 0x154   : > { %v1747_v32 = vpop.f32.mrf.mxu1  ;;  %v2177_v25 = vpop.f32.mrf.mxu0 }
 0x155   : > { %v6631_v44 = vadd.f32 %v5269_v7, %v1887_v55  ;;  %v1886_v36 = vadd.f32 %v1747_v32, %v6392_v24 }
 0x156   : > { %v5216_v1 = vpop.f32.mrf.mxu1  ;;  %v5272_v43 = vpop.f32.mrf.mxu0 }
 0x157   : > { %v6634_v8 = vadd.f32 %v2177_v25, %v1886_v36  ;;  %v1889_v56 = vadd.f32 %v5216_v1, %v6401_v33 }
 0x158   : > { %v1757_v15 = vpop.f32.mrf.mxu1  ;;  %v2187_v13 = vpop.f32.mrf.mxu0 }
 0x159   : > { %v6637_v26 = vadd.f32 %v5272_v43, %v1889_v56  ;;  %v1888_v41 = vadd.f32 %v1757_v15, %v6406_v37 }
 0x15a   : > { %v5219_v42 = vpop.f32.mrf.mxu1  ;;  %v5275_v51 = vpop.f32.mrf.mxu0 }
 0x15b   : > { %v6640_v57 = vadd.f32 %v2187_v13, %v1888_v41  ;;  %v1891_v60 = vadd.f32 %v5219_v42, %v6415_v47 }
 0x15c   : > { %v1767_v52 = vpop.f32.mrf.mxu1  ;;  %v2197_v24 = vpop.f32.mrf.mxu0 }
 0x15d   : > { %v6643_v62 = vadd.f32 %v5275_v51, %v1891_v60  ;;  %v1890_v14 = vadd.f32 %v1767_v52, %v6420_v2 }
 0x15e   : > { %v5222_v12 = vpop.f32.mrf.mxu1  ;;  %v5278_v33 = vpop.f32.mrf.mxu0 }
 0x15f   : > { %v6646_v19 = vadd.f32 %v2197_v24, %v1890_v14  ;;  %v1893_v38 = vadd.f32 %v5222_v12, %v6429_v4 }
 0x160   : > { %v1777_v21 = vpop.f32.mrf.mxu1  ;;  %v2207_v37 = vpop.f32.mrf.mxu0 }
 0x161   : > { %v6649_v53 = vadd.f32 %v5278_v33, %v1893_v38  ;;  %v1892_v28 = vadd.f32 %v1777_v21, %v6434_v29 }
 0x162   : > { %v5225_v50 = vpop.f32.mrf.mxu1  ;;  %v5281_v47 = vpop.f32.mrf.mxu0 }
 0x163   : > { %v6652_v46 = vadd.f32 %v2207_v37, %v1892_v28  ;;  %v1895_v7 = vadd.f32 %v5225_v50, %v6443_v10 }
 0x164   : > { %v1787_v55 = vpop.f32.mrf.mxu1  ;;  %v2217_v2 = vpop.f32.mrf.mxu0 }
 0x165   : > { %v6655_v32 = vadd.f32 %v5281_v47, %v1895_v7  ;;  %v1894_v25 = vadd.f32 %v1787_v55, %v6448_v48 }
 0x166   : > { %v5228_v36 = vpop.f32.mrf.mxu1  ;;  %v5284_v4 = vpop.f32.mrf.mxu0 }
 0x167   : > { %v6658_v1 = vadd.f32 %v2217_v2, %v1894_v25  ;;  %v1897_v43 = vadd.f32 %v5228_v36, %v6457_v16 }
 0x168   : > { %v1797_v56 = vpop.f32.mrf.mxu1  ;;  %v2227_v29 = vpop.f32.mrf.mxu0 }
 0x169   : > { %v6661_v15 = vadd.f32 %v5284_v4, %v1897_v43  ;;  %v1896_v13 = vadd.f32 %v1797_v56, %v6462_v9 }
 0x16a   : > { %v5231_v41 = vpop.f32.mrf.mxu1  ;;  %v5287_v10 = vpop.f32.mrf.mxu0 }
 0x16b   : > { %v6664_v42 = vadd.f32 %v2227_v29, %v1896_v13  ;;  %v1899_v51 = vadd.f32 %v5231_v41, %v6471_v22 }
 0x16c   : > { %v1807_v60 = vpop.f32.mrf.mxu1  ;;  %v2237_v48 = vpop.f32.mrf.mxu0 }
 0x16d   : > { %v6667_v52 = vadd.f32 %v5287_v10, %v1899_v51  ;;  %v1898_v24 = vadd.f32 %v1807_v60, %v6476_v63 }
 0x16e   : > { %v5234_v14 = vpop.f32.mrf.mxu1  ;;  %v5290_v16 = vpop.f32.mrf.mxu0 }
 0x16f   : > { %v6670_v12 = vadd.f32 %v2237_v48, %v1898_v24  ;;  %v1901_v33 = vadd.f32 %v5234_v14, %v6485_v39 }
 0x170   : > { %v1817_v38 = vpop.f32.mrf.mxu1  ;;  %v2247_v9 = vpop.f32.mrf.mxu0 }
 0x171   : > { %v6673_v21 = vadd.f32 %v5290_v16, %v1901_v33  ;;  %v1900_v37 = vadd.f32 %v1817_v38, %v6490_v61 }
 0x172   : > { %v5237_v28 = vpop.f32.mrf.mxu1  ;;  %v5293_v22 = vpop.f32.mrf.mxu0 }
 0x173   : > { %v6676_v50 = vadd.f32 %v2247_v9, %v1900_v37  ;;  %v1903_v47 = vadd.f32 %v5237_v28, %v6499_v45 }
 0x174   : > { %v1827_v7 = vpop.f32.mrf.mxu1  ;;  %v2257_v63 = vpop.f32.mrf.mxu0 }
 0x175   : > { %v6679_v55 = vadd.f32 %v5293_v22, %v1903_v47  ;;  %v1902_v2 = vadd.f32 %v1827_v7, %v6504_v18 }
 0x176   : > { %v5240_v25 = vpop.f32.mrf.mxu1  ;;  %v5296_v39 = vpop.f32.mrf.mxu0 }
 0x177   : > { %v6682_v36 = vadd.f32 %v2257_v63, %v1902_v2  ;;  %v1905_v4 = vadd.f32 %v5240_v25, %v6513_v59 }
 0x178   : > { %v1837_v43 = vpop.f32.mrf.mxu1  ;;  %v2267_v61 = vpop.f32.mrf.mxu0 }
 0x179   : > { %v6685_v56 = vadd.f32 %v5296_v39, %v1905_v4  ;;  %v1904_v29 = vadd.f32 %v1837_v43, %v6518_v34 }
 0x17a   : > { %v5243_v13 = vpop.f32.mrf.mxu1  ;;  %v5299_v45 = vpop.f32.mrf.mxu0 }
 0x17b   : > { %v6688_v41 = vadd.f32 %v2267_v61, %v1904_v29  ;;  %v1907_v10 = vadd.f32 %v5243_v13, %v6527_v3 }
 0x17c   : > { %v1847_v51 = vpop.f32.mrf.mxu1  ;;  %v2277_v18 = vpop.f32.mrf.mxu0 }
 0x17d   : > { %v6691_v60 = vadd.f32 %v5299_v45, %v1907_v10  ;;  %v1906_v48 = vadd.f32 %v1847_v51, %v6532_v54 }
 0x17e   : > { %v5246_v24 = vpop.f32.mrf.mxu1  ;;  %v5302_v59 = vpop.f32.mrf.mxu0 }
 0x17f   : > { %v6694_v14 = vadd.f32 %v2277_v18, %v1906_v48  ;;  %v1909_v16 = vadd.f32 %v5246_v24, %v6541_v58 }
 0x180   : > { %v1857_v33 = vpop.f32.mrf.mxu1  ;;  %v2287_v34 = vpop.f32.mrf.mxu0 }
 0x181   : > { %v6697_v38 = vadd.f32 %v5302_v59, %v1909_v16  ;;  %v1908_v9 = vadd.f32 %v1857_v33, %v6546_v27 }
 0x182   : > { %v5249_v37 = vpop.f32.mrf.mxu1  ;;  %v5305_v3 = vpop.f32.mrf.mxu0 }
 0x183   : > { %v6700_v28 = vadd.f32 %v2287_v34, %v1908_v9  ;;  %v1911_v22 = vadd.f32 %v5249_v37, %v6555_v5 }
 0x184   : > { %v1867_v47 = vpop.f32.mrf.mxu1  ;;  %v2297_v54 = vpop.f32.mrf.mxu0 }
 0x185   : > { %v6703_v7 = vadd.f32 %v5305_v3, %v1911_v22  ;;  %v1910_v63 = vadd.f32 %v1867_v47, %v6560_v40 }
 0x186   : > { %v5310_v2 = vpop.f32.mrf.mxu1  ;;  %v5366_v58 = vpop.f32.mrf.mxu0 }
 0x187   : > { %v6706_v25 = vadd.f32 %v2297_v54, %v1910_v63  ;;  %v2737_v39 = vadd.f32 %v5310_v2, %v6569_v11 }
 0x188   : > { %v2557_v4 = vpop.f32.mrf.mxu1  ;;  %v2987_v27 = vpop.f32.mrf.mxu0 }
 0x189   : > { %v6709_v43 = vadd.f32 %v5366_v58, %v2737_v39  ;;  %v2736_v61 = vadd.f32 %v2557_v4, %v6574_v6 }
 0x18a   : > { %v5313_v29 = vpop.f32.mrf.mxu1  ;;  %v5369_v5 = vpop.f32.mrf.mxu0 }
 0x18b   : > { %v6712_v13 = vadd.f32 %v2987_v27, %v2736_v61  ;;  %v2739_v45 = vadd.f32 %v5313_v29, %v6583_v17 }
 0x18c   : > { %v2567_v10 = vpop.f32.mrf.mxu1  ;;  %v2997_v40 = vpop.f32.mrf.mxu0 }
 0x18d   : > { %v6715_v51 = vadd.f32 %v5369_v5, %v2739_v45  ;;  %v2738_v18 = vadd.f32 %v2567_v10, %v6588_v30 }
 0x18e   : > { %v5316_v48 = vpop.f32.mrf.mxu1  ;;  %v5372_v11 = vpop.f32.mrf.mxu0 }
 0x18f   : > { %v6718_v24 = vadd.f32 %v2997_v40, %v2738_v18  ;;  %v2741_v59 = vadd.f32 %v5316_v48, %v6597_v23 }
 0x190   : > { %v2577_v16 = vpop.f32.mrf.mxu1  ;;  %v3007_v6 = vpop.f32.mrf.mxu0 }
 0x191   : > { %v6721_v33 = vadd.f32 %v5372_v11, %v2741_v59  ;;  %v2740_v34 = vadd.f32 %v2577_v16, %v6602_v49 }
 0x192   : > { %v5319_v9 = vpop.f32.mrf.mxu1  ;;  %v5375_v17 = vpop.f32.mrf.mxu0 }
 0x193   : > { %v6724_v37 = vadd.f32 %v3007_v6, %v2740_v34  ;;  %v2743_v3 = vadd.f32 %v5319_v9, %v6611_v35 }
 0x194   : > { %v2587_v22 = vpop.f32.mrf.mxu1  ;;  %v3017_v30 = vpop.f32.mrf.mxu0 }
 0x195   : > { %v6727_v47 = vadd.f32 %v5375_v17, %v2743_v3  ;;  %v2742_v54 = vadd.f32 %v2587_v22, %v6616_v31 }
 0x196   : > { %v5322_v63 = vpop.f32.mrf.mxu1  ;;  %v5378_v23 = vpop.f32.mrf.mxu0 }
 0x197   : > { %v6730_v2 = vadd.f32 %v3017_v30, %v2742_v54  ;;  %v2745_v58 = vadd.f32 %v5322_v63, %v6623_v0 }
 0x198   : > { %v2597_v39 = vpop.f32.mrf.mxu1  ;;  %v3027_v49 = vpop.f32.mrf.mxu0 }
 0x199   : > { %v6733_v4 = vadd.f32 %v5378_v23, %v2745_v58  ;;  %v2744_v27 = vadd.f32 %v2597_v39, %v6628_v20 }
 0x19a   : > { %v5325_v61 = vpop.f32.mrf.mxu1  ;;  %v5381_v35 = vpop.f32.mrf.mxu0 }
 0x19b   : > { %v6736_v29 = vadd.f32 %v3027_v49, %v2744_v27  ;;  %v2747_v5 = vadd.f32 %v5325_v61, %v6631_v44 }
 0x19c   : > { %v2607_v45 = vpop.f32.mrf.mxu1  ;;  %v3037_v31 = vpop.f32.mrf.mxu0 }
 0x19d   : > { %v6739_v10 = vadd.f32 %v5381_v35, %v2747_v5  ;;  %v2746_v40 = vadd.f32 %v2607_v45, %v6634_v8 }
 0x19e   : > { %v5328_v18 = vpop.f32.mrf.mxu1  ;;  %v5384_v0 = vpop.f32.mrf.mxu0 }
 0x19f   : > { %v6742_v48 = vadd.f32 %v3037_v31, %v2746_v40  ;;  %v2749_v11 = vadd.f32 %v5328_v18, %v6637_v26 }
 0x1a0   : > { %v2617_v59 = vpop.f32.mrf.mxu1  ;;  %v3047_v20 = vpop.f32.mrf.mxu0 }
 0x1a1   : > { %v6745_v16 = vadd.f32 %v5384_v0, %v2749_v11  ;;  %v2748_v6 = vadd.f32 %v2617_v59, %v6640_v57 }
 0x1a2   : > { %v5331_v34 = vpop.f32.mrf.mxu1  ;;  %v5387_v44 = vpop.f32.mrf.mxu0 }
 0x1a3   : > { %v6748_v9 = vadd.f32 %v3047_v20, %v2748_v6  ;;  %v2751_v17 = vadd.f32 %v5331_v34, %v6643_v62 }
 0x1a4   : > { %v2627_v3 = vpop.f32.mrf.mxu1  ;;  %v3057_v8 = vpop.f32.mrf.mxu0 }
 0x1a5   : > { %v6751_v22 = vadd.f32 %v5387_v44, %v2751_v17  ;;  %v2750_v30 = vadd.f32 %v2627_v3, %v6646_v19 }
 0x1a6   : > { %v5334_v54 = vpop.f32.mrf.mxu1  ;;  %v5390_v26 = vpop.f32.mrf.mxu0 }
 0x1a7   : > { %v6754_v63 = vadd.f32 %v3057_v8, %v2750_v30  ;;  %v2753_v23 = vadd.f32 %v5334_v54, %v6649_v53 }
 0x1a8   : > { %v2637_v58 = vpop.f32.mrf.mxu1  ;;  %v3067_v57 = vpop.f32.mrf.mxu0 }
 0x1a9   : > { %v6757_v39 = vadd.f32 %v5390_v26, %v2753_v23  ;;  %v2752_v49 = vadd.f32 %v2637_v58, %v6652_v46 }
 0x1aa   : > { %v5337_v27 = vpop.f32.mrf.mxu1  ;;  %v5393_v62 = vpop.f32.mrf.mxu0 }
 0x1ab   : > { %v6760_v61 = vadd.f32 %v3067_v57, %v2752_v49  ;;  %v2755_v35 = vadd.f32 %v5337_v27, %v6655_v32 }
 0x1ac   : > { %v2647_v5 = vpop.f32.mrf.mxu1  ;;  %v3077_v19 = vpop.f32.mrf.mxu0 }
 0x1ad   : > { %v6763_v45 = vadd.f32 %v5393_v62, %v2755_v35  ;;  %v2754_v31 = vadd.f32 %v2647_v5, %v6658_v1 }
 0x1ae   : > { %v5340_v40 = vpop.f32.mrf.mxu1  ;;  %v5396_v53 = vpop.f32.mrf.mxu0 }
 0x1af   : > { %v6766_v18 = vadd.f32 %v3077_v19, %v2754_v31  ;;  %v2757_v0 = vadd.f32 %v5340_v40, %v6661_v15 }
 0x1b0   : > { %v2657_v11 = vpop.f32.mrf.mxu1  ;;  %v3087_v46 = vpop.f32.mrf.mxu0 }
 0x1b1   : > { %v6769_v59 = vadd.f32 %v5396_v53, %v2757_v0  ;;  %v2756_v20 = vadd.f32 %v2657_v11, %v6664_v42 }
 0x1b2   : > { %v5343_v6 = vpop.f32.mrf.mxu1  ;;  %v5399_v32 = vpop.f32.mrf.mxu0 }
 0x1b3   : > { %v6772_v34 = vadd.f32 %v3087_v46, %v2756_v20  ;;  %v2759_v44 = vadd.f32 %v5343_v6, %v6667_v52 }
 0x1b4   : > { %v2667_v17 = vpop.f32.mrf.mxu1  ;;  %v3097_v1 = vpop.f32.mrf.mxu0 }
 0x1b5   : > { %v6775_v3 = vadd.f32 %v5399_v32, %v2759_v44  ;;  %v2758_v8 = vadd.f32 %v2667_v17, %v6670_v12 }
 0x1b6   : > { %v5346_v30 = vpop.f32.mrf.mxu1  ;;  %v5402_v15 = vpop.f32.mrf.mxu0 }
 0x1b7   : > { %v6778_v54 = vadd.f32 %v3097_v1, %v2758_v8  ;;  %v2761_v26 = vadd.f32 %v5346_v30, %v6673_v21 }
 0x1b8   : > { %v2677_v23 = vpop.f32.mrf.mxu1  ;;  %v3107_v42 = vpop.f32.mrf.mxu0 }
 0x1b9   : > { %v6781_v58 = vadd.f32 %v5402_v15, %v2761_v26  ;;  %v2760_v57 = vadd.f32 %v2677_v23, %v6676_v50 }
 0x1ba   : > { %v5349_v49 = vpop.f32.mrf.mxu1  ;;  %v5405_v52 = vpop.f32.mrf.mxu0 }
 0x1bb   : > { %v6784_v27 = vadd.f32 %v3107_v42, %v2760_v57  ;;  %v2763_v62 = vadd.f32 %v5349_v49, %v6679_v55 }
 0x1bc   : > { %v2687_v35 = vpop.f32.mrf.mxu1  ;;  %v3117_v12 = vpop.f32.mrf.mxu0 }
 0x1bd   : > { %v6787_v5 = vadd.f32 %v5405_v52, %v2763_v62  ;;  %v2762_v19 = vadd.f32 %v2687_v35, %v6682_v36 }
 0x1be   : > { %v5352_v31 = vpop.f32.mrf.mxu1  ;;  %v5408_v21 = vpop.f32.mrf.mxu0 }
 0x1bf   : > { %v6790_v40 = vadd.f32 %v3117_v12, %v2762_v19  ;;  %v2765_v53 = vadd.f32 %v5352_v31, %v6685_v56 }
 0x1c0   : > { %v2697_v0 = vpop.f32.mrf.mxu1  ;;  %v3127_v50 = vpop.f32.mrf.mxu0 }
 0x1c1   : > { %v6793_v11 = vadd.f32 %v5408_v21, %v2765_v53  ;;  %v2764_v46 = vadd.f32 %v2697_v0, %v6688_v41 }
 0x1c2   : > { %v5355_v20 = vpop.f32.mrf.mxu1  ;;  %v5411_v55 = vpop.f32.mrf.mxu0 }
 0x1c3   : > { %v6796_v6 = vadd.f32 %v3127_v50, %v2764_v46  ;;  %v2767_v32 = vadd.f32 %v5355_v20, %v6691_v60 }
 0x1c4   : > { %v2707_v44 = vpop.f32.mrf.mxu1  ;;  %v3137_v36 = vpop.f32.mrf.mxu0 }
 0x1c5   : > { %v6799_v17 = vadd.f32 %v5411_v55, %v2767_v32  ;;  %v2766_v1 = vadd.f32 %v2707_v44, %v6694_v14 }
 0x1c6   : > { %v5358_v8 = vpop.f32.mrf.mxu1  ;;  %v5414_v56 = vpop.f32.mrf.mxu0 }
 0x1c7   : > { %v6802_v30 = vadd.f32 %v3137_v36, %v2766_v1  ;;  %v2769_v15 = vadd.f32 %v5358_v8, %v6697_v38 }
 0x1c8   : > { %v2717_v26 = vpop.f32.mrf.mxu1  ;;  %v3147_v41 = vpop.f32.mrf.mxu0 }
 0x1c9   : > { %v6805_v23 = vadd.f32 %v5414_v56, %v2769_v15  ;;  %v2768_v42 = vadd.f32 %v2717_v26, %v6700_v28  ;;  %v6820_v28 = vld [vmem:[%s7023_s2] ss:$0 sm:$0xff] }
 0x1ca   : > { %v5361_v57 = vpop.f32.mrf.mxu1  ;;  %v5417_v60 = vpop.f32.mrf.mxu0 }
 0x1cb   : > { %v6808_v49 = vadd.f32 %v3147_v41, %v2768_v42  ;;  %v2771_v52 = vadd.f32 %v5361_v57, %v6703_v7 }
 0x1cc   : > { %v2727_v14 = vpop.f32.mrf.mxu1  ;;  %v3157_v62 = vpop.f32.mrf.mxu0 }
 0x1cd   : > { %v6811_v35 = vadd.f32 %v5417_v60, %v2771_v52  ;;  %v2770_v12 = vadd.f32 %v2727_v14, %v6706_v25  ;;  %v6827_v25 = vld [vmem:[%s7024_s3] ss:$0 sm:$0xff] }
 0x1ce   : > { %v5422_v38 = vpop.f32.mrf.mxu1  ;;  %v5478_v19 = vpop.f32.mrf.mxu0 }
 0x1cf   : > { %v6814_v31 = vadd.f32 %v3157_v62, %v2770_v12  ;;  %v3597_v21 = vadd.f32 %v5422_v38, %v6709_v43 }
 0x1d0   : > { %v3417_v53 = vpop.f32.mrf.mxu1  ;;  %v3847_v0 = vpop.f32.mrf.mxu0 }
 0x1d1   : > { %v4027_v7 = vadd.f32 %v5478_v19, %v3597_v21  ;;  %v3596_v50 = vadd.f32 %v3417_v53, %v6712_v13 }
 0x1d2   : > { %v5425_v46 = vpop.f32.mrf.mxu1  ;;  %v5481_v20 = vpop.f32.mrf.mxu0 }
 0x1d3   : > { %v4070_v43 = vmul.f32 %v6820_v28, %v4027_v7  ;;  %v4026_v55 = vadd.f32 %v3847_v0, %v3596_v50  ;;  %v3599_v32 = vadd.f32 %v5425_v46, %v6715_v51 }
 0x1d4   : > { %v3427_v44 = vpop.f32.mrf.mxu1  ;;  %v3857_v36 = vpop.f32.mrf.mxu0 }
 0x1d5   : > { %v4113_v1 = vadd.f32 %v6827_v25, %v4070_v43  ;;  %v4069_v8 = vmul.f32 %v6820_v28, %v4026_v55  ;;  %v4029_v13 = vadd.f32 %v5481_v20, %v3599_v32  ;;  %v3598_v56 = vadd.f32 %v3427_v44, %v6718_v24 }
 0x1d6   : > { %v5428_v15 = vpop.f32.mrf.mxu1  ;;  %v5484_v26 = vpop.f32.mrf.mxu0 }
 0x1d7   : > { %v4149_v51 = vmax.f32 %v4113_v1, 0.0  ;;  %v4112_v41 = vadd.f32 %v6827_v25, %v4069_v8  ;;  %v4072_v42 = vmul.f32 %v6820_v28, %v4029_v13  ;;  %v4028_v57 = vadd.f32 %v3857_v36, %v3598_v56 }
 0x1d8   : > { %v3601_v60 = vadd.f32 %v5428_v15, %v6721_v33  ;;  %v3437_v52 = vpop.f32.mrf.mxu1  ;;  %v3867_v24 = vpop.f32.mrf.mxu0 }
 0x1d9   : > { %4186 = vst.msk [vmem:[%s6837_s25 + $0x8] sm:$0xff] %vm4184_vm2, %v4149_v51  ;;  %v4148_v14 = vmax.f32 %v4112_v41, 0.0  ;;  %v4115_v62 = vadd.f32 %v6827_v25, %v4072_v42  ;;  %v4071_v12 = vmul.f32 %v6820_v28, %v4028_v57  ;;  %v3600_v38 = vadd.f32 %v3437_v52, %v6724_v37 }
 0x1da   : > { %v4031_v19 = vadd.f32 %v5484_v26, %v3601_v60  ;;  %v5431_v21 = vpop.f32.mrf.mxu1  ;;  %v5487_v53 = vpop.f32.mrf.mxu0 }
 0x1db   : > { %4185 = vst.msk [vmem:[%s6837_s25] sm:$0xff] %vm4184_vm2, %v4148_v14  ;;  %v4151_v0 = vmax.f32 %v4115_v62, 0.0  ;;  %v4114_v33 = vadd.f32 %v6827_v25, %v4071_v12  ;;  %v4030_v7 = vadd.f32 %v3867_v24, %v3600_v38  ;;  %v3603_v50 = vadd.f32 %v5431_v21, %v6727_v47 }
 0x1dc   : > { %v4074_v46 = vmul.f32 %v6820_v28, %v4031_v19  ;;  %v3447_v20 = vpop.f32.mrf.mxu1  ;;  %v3877_v43 = vpop.f32.mrf.mxu0 }
 0x1dd   : > { %4188 = vst.msk [vmem:[%s6837_s25 + $0x18] sm:$0xff] %vm4184_vm2, %v4151_v0  ;;  %v4150_v55 = vmax.f32 %v4114_v33, 0.0  ;;  %v4073_v37 = vmul.f32 %v6820_v28, %v4030_v7  ;;  %v4033_v32 = vadd.f32 %v5487_v53, %v3603_v50  ;;  %v3602_v44 = vadd.f32 %v3447_v20, %v6730_v2 }
 0x1de   : > { %v4117_v36 = vadd.f32 %v6827_v25, %v4074_v46  ;;  %v5434_v1 = vpop.f32.mrf.mxu1  ;;  %v5490_v8 = vpop.f32.mrf.mxu0 }
 0x1df   : > { %4187 = vst.msk [vmem:[%s6837_s25 + $0x10] sm:$0xff] %vm4184_vm2, %v4150_v55  ;;  %v4116_v47 = vadd.f32 %v6827_v25, %v4073_v37  ;;  %v4076_v13 = vmul.f32 %v6820_v28, %v4033_v32  ;;  %v4032_v56 = vadd.f32 %v3877_v43, %v3602_v44  ;;  %v3605_v15 = vadd.f32 %v5434_v1, %v6733_v4 }
 0x1e0   : > { %v4153_v26 = vmax.f32 %v4117_v36, 0.0  ;;  %v3457_v51 = vpop.f32.mrf.mxu1  ;;  %v3887_v41 = vpop.f32.mrf.mxu0 }
 0x1e1   : > { %v4152_v42 = vmax.f32 %v4116_v47, 0.0  ;;  %v4119_v2 = vadd.f32 %v6827_v25, %v4076_v13  ;;  %v4075_v57 = vmul.f32 %v6820_v28, %v4032_v56  ;;  %v4035_v60 = vadd.f32 %v5490_v8, %v3605_v15 }
 0x1e2   : > { %4190 = vst.msk [vmem:[%s6837_s25 + $0x28] sm:$0xff] %vm4184_vm2, %v4153_v26  ;;  %v3604_v52 = vadd.f32 %v3457_v51, %v6736_v29  ;;  %v5437_v24 = vpop.f32.mrf.mxu1  ;;  %v5493_v14 = vpop.f32.mrf.mxu0 }
 0x1e3   : > { %4189 = vst.msk [vmem:[%s6837_s25 + $0x20] sm:$0xff] %vm4184_vm2, %v4152_v42  ;;  %v4155_v4 = vmax.f32 %v4119_v2, 0.0  ;;  %v4118_v62 = vadd.f32 %v6827_v25, %v4075_v57  ;;  %v4078_v12 = vmul.f32 %v6820_v28, %v4035_v60  ;;  %v3607_v38 = vadd.f32 %v5437_v24, %v6739_v10 }
 0x1e4   : > { %v4034_v19 = vadd.f32 %v3887_v41, %v3604_v52  ;;  %v3467_v21 = vpop.f32.mrf.mxu1  ;;  %v3897_v53 = vpop.f32.mrf.mxu0 }
 0x1e5   : > { %4192 = vst.msk [vmem:[%s6837_s25 + $0x38] sm:$0xff] %vm4184_vm2, %v4155_v4  ;;  %v4154_v0 = vmax.f32 %v4118_v62, 0.0  ;;  %v4121_v29 = vadd.f32 %v6827_v25, %v4078_v12  ;;  %v4037_v33 = vadd.f32 %v5493_v14, %v3607_v38  ;;  %v3606_v7 = vadd.f32 %v3467_v21, %v6742_v48 }
 0x1e6   : > { %v4077_v50 = vmul.f32 %v6820_v28, %v4034_v19  ;;  %v5440_v46 = vpop.f32.mrf.mxu1  ;;  %v5496_v20 = vpop.f32.mrf.mxu0 }
 0x1e7   : > { %4191 = vst.msk [vmem:[%s6837_s25 + $0x30] sm:$0xff] %vm4184_vm2, %v4154_v0  ;;  %v4157_v43 = vmax.f32 %v4121_v29, 0.0  ;;  %v4080_v10 = vmul.f32 %v6820_v28, %v4037_v33  ;;  %v4036_v55 = vadd.f32 %v3897_v53, %v3606_v7  ;;  %v3609_v37 = vadd.f32 %v5440_v46, %v6745_v16 }
 0x1e8   : > { %v4120_v32 = vadd.f32 %v6827_v25, %v4077_v50  ;;  %v3477_v44 = vpop.f32.mrf.mxu1  ;;  %v3907_v36 = vpop.f32.mrf.mxu0 }
 0x1e9   : > { %4194 = vst.msk [vmem:[%s6837_s25 + $0x48] sm:$0xff] %vm4184_vm2, %v4157_v43  ;;  %v4123_v48 = vadd.f32 %v6827_v25, %v4080_v10  ;;  %v4079_v1 = vmul.f32 %v6820_v28, %v4036_v55  ;;  %v4039_v8 = vadd.f32 %v5496_v20, %v3609_v37  ;;  %v3608_v47 = vadd.f32 %v3477_v44, %v6748_v9 }
 0x1ea   : > { %v4156_v13 = vmax.f32 %v4120_v32, 0.0  ;;  %v5443_v56 = vpop.f32.mrf.mxu1  ;;  %v5499_v15 = vpop.f32.mrf.mxu0 }
 0x1eb   : > { %v4159_v26 = vmax.f32 %v4123_v48, 0.0  ;;  %v4122_v16 = vadd.f32 %v6827_v25, %v4079_v1  ;;  %v4082_v51 = vmul.f32 %v6820_v28, %v4039_v8  ;;  %v4038_v41 = vadd.f32 %v3907_v36, %v3608_v47 }
 0x1ec   : > { %4193 = vst.msk [vmem:[%s6837_s25 + $0x40] sm:$0xff] %vm4184_vm2, %v4156_v13  ;;  %v3611_v42 = vadd.f32 %v5443_v56, %v6751_v22  ;;  %v3487_v2 = vpop.f32.mrf.mxu1  ;;  %v3917_v57 = vpop.f32.mrf.mxu0 }
 0x1ed   : > { %4196 = vst.msk [vmem:[%s6837_s25 + $0x58] sm:$0xff] %vm4184_vm2, %v4159_v26  ;;  %v4158_v9 = vmax.f32 %v4122_v16, 0.0  ;;  %v4125_v60 = vadd.f32 %v6827_v25, %v4082_v51  ;;  %v4081_v52 = vmul.f32 %v6820_v28, %v4038_v41  ;;  %v3610_v24 = vadd.f32 %v3487_v2, %v6754_v63 }
 0x1ee   : > { %v4041_v14 = vadd.f32 %v5499_v15, %v3611_v42  ;;  %v5446_v4 = vpop.f32.mrf.mxu1  ;;  %v5502_v62 = vpop.f32.mrf.mxu0 }
 0x1ef   : > { %4195 = vst.msk [vmem:[%s6837_s25 + $0x50] sm:$0xff] %vm4184_vm2, %v4158_v9  ;;  %v4161_v12 = vmax.f32 %v4125_v60, 0.0  ;;  %v4124_v22 = vadd.f32 %v6827_v25, %v4081_v52  ;;  %v4040_v38 = vadd.f32 %v3917_v57, %v3610_v24  ;;  %v3613_v19 = vadd.f32 %v5446_v4, %v6757_v39 }
 0x1f0   : > { %v4084_v21 = vmul.f32 %v6820_v28, %v4041_v14  ;;  %v3497_v53 = vpop.f32.mrf.mxu1  ;;  %v3927_v0 = vpop.f32.mrf.mxu0 }
 0x1f1   : > { %4198 = vst.msk [vmem:[%s6837_s25 + $0x68] sm:$0xff] %vm4184_vm2, %v4161_v12  ;;  %v4160_v29 = vmax.f32 %v4124_v22, 0.0  ;;  %v4083_v63 = vmul.f32 %v6820_v28, %v4040_v38  ;;  %v4043_v33 = vadd.f32 %v5502_v62, %v3613_v19  ;;  %v3612_v7 = vadd.f32 %v3497_v53, %v6760_v61 }
 0x1f2   : > { %v4127_v50 = vadd.f32 %v6827_v25, %v4084_v21  ;;  %v5449_v46 = vpop.f32.mrf.mxu1  ;;  %v5505_v20 = vpop.f32.mrf.mxu0 }
 0x1f3   : > { %4197 = vst.msk [vmem:[%s6837_s25 + $0x60] sm:$0xff] %vm4184_vm2, %v4160_v29  ;;  %v4126_v39 = vadd.f32 %v6827_v25, %v4083_v63  ;;  %v4086_v43 = vmul.f32 %v6820_v28, %v4043_v33  ;;  %v4042_v10 = vadd.f32 %v3927_v0, %v3612_v7  ;;  %v3615_v55 = vadd.f32 %v5449_v46, %v6763_v45 }
 0x1f4   : > { %v4163_v37 = vmax.f32 %v4127_v50, 0.0  ;;  %v3507_v32 = vpop.f32.mrf.mxu1  ;;  %v3937_v44 = vpop.f32.mrf.mxu0 }
 0x1f5   : > { %v4162_v36 = vmax.f32 %v4126_v39, 0.0  ;;  %v4129_v61 = vadd.f32 %v6827_v25, %v4086_v43  ;;  %v4085_v48 = vmul.f32 %v6820_v28, %v4042_v10  ;;  %v4045_v1 = vadd.f32 %v5505_v20, %v3615_v55 }
 0x1f6   : > { %4200 = vst.msk [vmem:[%s6837_s25 + $0x78] sm:$0xff] %vm4184_vm2, %v4163_v37  ;;  %v3614_v8 = vadd.f32 %v3507_v32, %v6766_v18  ;;  %v5452_v47 = vpop.f32.mrf.mxu1  ;;  %v5508_v13 = vpop.f32.mrf.mxu0 }
 0x1f7   : > { %4199 = vst.msk [vmem:[%s6837_s25 + $0x70] sm:$0xff] %vm4184_vm2, %v4162_v36  ;;  %v4165_v45 = vmax.f32 %v4129_v61, 0.0  ;;  %v4128_v56 = vadd.f32 %v6827_v25, %v4085_v48  ;;  %v4088_v15 = vmul.f32 %v6820_v28, %v4045_v1  ;;  %v3617_v26 = vadd.f32 %v5452_v47, %v6769_v59 }
 0x1f8   : > { %v4044_v16 = vadd.f32 %v3937_v44, %v3614_v8  ;;  %v3517_v51 = vpop.f32.mrf.mxu1  ;;  %v3947_v41 = vpop.f32.mrf.mxu0 }
 0x1f9   : > { %4202 = vst.msk [vmem:[%s6837_s25 + $0x88] sm:$0xff] %vm4184_vm2, %v4165_v45  ;;  %v4164_v42 = vmax.f32 %v4128_v56, 0.0  ;;  %v4131_v18 = vadd.f32 %v6827_v25, %v4088_v15  ;;  %v4047_v2 = vadd.f32 %v5508_v13, %v3617_v26  ;;  %v3616_v57 = vadd.f32 %v3517_v51, %v6772_v34 }
 0x1fa   : > { %v4087_v9 = vmul.f32 %v6820_v28, %v4044_v16  ;;  %v5455_v60 = vpop.f32.mrf.mxu1  ;;  %v5511_v52 = vpop.f32.mrf.mxu0 }
 0x1fb   : > { %4201 = vst.msk [vmem:[%s6837_s25 + $0x80] sm:$0xff] %vm4184_vm2, %v4164_v42  ;;  %v4167_v24 = vmax.f32 %v4131_v18, 0.0  ;;  %v4090_v59 = vmul.f32 %v6820_v28, %v4047_v2  ;;  %v4046_v14 = vadd.f32 %v3947_v41, %v3616_v57  ;;  %v3619_v4 = vadd.f32 %v5455_v60, %v6775_v3 }
 0x1fc   : > { %v4130_v62 = vadd.f32 %v6827_v25, %v4087_v9  ;;  %v3527_v12 = vpop.f32.mrf.mxu1  ;;  %v3957_v22 = vpop.f32.mrf.mxu0 }
 0x1fd   : > { %4204 = vst.msk [vmem:[%s6837_s25 + $0x98] sm:$0xff] %vm4184_vm2, %v4167_v24  ;;  %v4133_v34 = vadd.f32 %v6827_v25, %v4090_v59  ;;  %v4089_v38 = vmul.f32 %v6820_v28, %v4046_v14  ;;  %v4049_v19 = vadd.f32 %v5511_v52, %v3619_v4  ;;  %v3618_v21 = vadd.f32 %v3527_v12, %v6778_v54 }
 0x1fe   : > { %v4166_v53 = vmax.f32 %v4130_v62, 0.0  ;;  %v5458_v0 = vpop.f32.mrf.mxu1  ;;  %v5514_v29 = vpop.f32.mrf.mxu0 }
 0x1ff   : > { %v4169_v63 = vmax.f32 %v4133_v34, 0.0  ;;  %v4132_v3 = vadd.f32 %v6827_v25, %v4089_v38  ;;  %v4092_v33 = vmul.f32 %v6820_v28, %v4049_v19  ;;  %v4048_v7 = vadd.f32 %v3957_v22, %v3618_v21 }
 0x200   : > { %4203 = vst.msk [vmem:[%s6837_s25 + $0x90] sm:$0xff] %vm4184_vm2, %v4166_v53  ;;  %v3621_v50 = vadd.f32 %v5458_v0, %v6781_v58  ;;  %v3537_v46 = vpop.f32.mrf.mxu1  ;;  %v3967_v20 = vpop.f32.mrf.mxu0 }
 0x201   : > { %4206 = vst.msk [vmem:[%s6837_s25 + $0xa8] sm:$0xff] %vm4184_vm2, %v4169_v63  ;;  %v4168_v54 = vmax.f32 %v4132_v3, 0.0  ;;  %v4135_v39 = vadd.f32 %v6827_v25, %v4092_v33  ;;  %v4091_v43 = vmul.f32 %v6820_v28, %v4048_v7  ;;  %v3620_v10 = vadd.f32 %v3537_v46, %v6784_v27 }
 0x202   : > { %v4051_v55 = vadd.f32 %v5514_v29, %v3621_v50  ;;  %v5461_v37 = vpop.f32.mrf.mxu1  ;;  %v5517_v32 = vpop.f32.mrf.mxu0 }
 0x203   : > { %4205 = vst.msk [vmem:[%s6837_s25 + $0xa0] sm:$0xff] %vm4184_vm2, %v4168_v54  ;;  %v4171_v44 = vmax.f32 %v4135_v39, 0.0  ;;  %v4134_v58 = vadd.f32 %v6827_v25, %v4091_v43  ;;  %v4050_v36 = vadd.f32 %v3967_v20, %v3620_v10  ;;  %v3623_v61 = vadd.f32 %v5461_v37, %v6787_v5 }
 0x204   : > { %v4094_v48 = vmul.f32 %v6820_v28, %v4051_v55  ;;  %v3547_v1 = vpop.f32.mrf.mxu1  ;;  %v3977_v8 = vpop.f32.mrf.mxu0 }
 0x205   : > { %4208 = vst.msk [vmem:[%s6837_s25 + $0xb8] sm:$0xff] %vm4184_vm2, %v4171_v44  ;;  %v4170_v47 = vmax.f32 %v4134_v58, 0.0  ;;  %v4093_v27 = vmul.f32 %v6820_v28, %v4050_v36  ;;  %v4053_v13 = vadd.f32 %v5517_v32, %v3623_v61  ;;  %v3622_v45 = vadd.f32 %v3547_v1, %v6790_v40 }
 0x206   : > { %v4137_v56 = vadd.f32 %v6827_v25, %v4094_v48  ;;  %v5464_v15 = vpop.f32.mrf.mxu1  ;;  %v5520_v26 = vpop.f32.mrf.mxu0 }
 0x207   : > { %4207 = vst.msk [vmem:[%s6837_s25 + $0xb0] sm:$0xff] %vm4184_vm2, %v4170_v47  ;;  %v4136_v5 = vadd.f32 %v6827_v25, %v4093_v27  ;;  %v4096_v16 = vmul.f32 %v6820_v28, %v4053_v13  ;;  %v4052_v51 = vadd.f32 %v3977_v8, %v3622_v45  ;;  %v3625_v41 = vadd.f32 %v5464_v15, %v6793_v11 }
 0x208   : > { %v4173_v42 = vmax.f32 %v4137_v56, 0.0  ;;  %v3557_v18 = vpop.f32.mrf.mxu1  ;;  %v3987_v2 = vpop.f32.mrf.mxu0 }
 0x209   : > { %v4172_v57 = vmax.f32 %v4136_v5, 0.0  ;;  %v4139_v40 = vadd.f32 %v6827_v25, %v4096_v16  ;;  %v4095_v9 = vmul.f32 %v6820_v28, %v4052_v51  ;;  %v4055_v60 = vadd.f32 %v5520_v26, %v3625_v41 }
 0x20a   : > { %4210 = vst.msk [vmem:[%s6837_s25 + $0xc8] sm:$0xff] %vm4184_vm2, %v4173_v42  ;;  %v3624_v52 = vadd.f32 %v3557_v18, %v6796_v6  ;;  %v5467_v24 = vpop.f32.mrf.mxu1  ;;  %v5523_v59 = vpop.f32.mrf.mxu0 }
 0x20b   : > { %4209 = vst.msk [vmem:[%s6837_s25 + $0xc0] sm:$0xff] %vm4184_vm2, %v4172_v57  ;;  %v4175_v11 = vmax.f32 %v4139_v40, 0.0  ;;  %v4138_v14 = vadd.f32 %v6827_v25, %v4095_v9  ;;  %v4098_v4 = vmul.f32 %v6820_v28, %v4055_v60  ;;  %v3627_v62 = vadd.f32 %v5467_v24, %v6799_v17 }
 0x20c   : > { %v4054_v12 = vadd.f32 %v3987_v2, %v3624_v52  ;;  %v3567_v22 = vpop.f32.mrf.mxu1  ;;  %v3997_v34 = vpop.f32.mrf.mxu0 }
 0x20d   : > { %4212 = vst.msk [vmem:[%s6837_s25 + $0xd8] sm:$0xff] %vm4184_vm2, %v4175_v11  ;;  %v4174_v38 = vmax.f32 %v4138_v14, 0.0  ;;  %v4141_v6 = vadd.f32 %v6827_v25, %v4098_v4  ;;  %v4057_v19 = vadd.f32 %v5523_v59, %v3627_v62  ;;  %v3626_v21 = vadd.f32 %v3567_v22, %v6802_v30 }
 0x20e   : > { %v4097_v53 = vmul.f32 %v6820_v28, %v4054_v12  ;;  %v5470_v0 = vpop.f32.mrf.mxu1  ;;  %v5526_v29 = vpop.f32.mrf.mxu0 }
 0x20f   : > { %4211 = vst.msk [vmem:[%s6837_s25 + $0xd0] sm:$0xff] %vm4184_vm2, %v4174_v38  ;;  %v4177_v63 = vmax.f32 %v4141_v6, 0.0  ;;  %v4100_v17 = vmul.f32 %v6820_v28, %v4057_v19  ;;  %v4056_v3 = vadd.f32 %v3997_v34, %v3626_v21  ;;  %v3629_v33 = vadd.f32 %v5470_v0, %v6805_v23 }
 0x210   : > { %v4140_v7 = vadd.f32 %v6827_v25, %v4097_v53  ;;  %v3577_v50 = vpop.f32.mrf.mxu1  ;;  %v4007_v46 = vpop.f32.mrf.mxu0 }
 0x211   : > { %4214 = vst.msk [vmem:[%s6837_s25 + $0xe8] sm:$0xff] %vm4184_vm2, %v4177_v63  ;;  %v4143_v30 = vadd.f32 %v6827_v25, %v4100_v17  ;;  %v4099_v20 = vmul.f32 %v6820_v28, %v4056_v3  ;;  %v4059_v54 = vadd.f32 %v5526_v29, %v3629_v33  ;;  %v3628_v39 = vadd.f32 %v3577_v50, %v6808_v49 }
 0x212   : > { %v4176_v43 = vmax.f32 %v4140_v7, 0.0  ;;  %v5473_v10 = vpop.f32.mrf.mxu1  ;;  %v5529_v55 = vpop.f32.mrf.mxu0 }
 0x213   : > { %v4179_v23 = vmax.f32 %v4143_v30, 0.0  ;;  %v4142_v37 = vadd.f32 %v6827_v25, %v4099_v20  ;;  %v4102_v32 = vmul.f32 %v6820_v28, %v4059_v54  ;;  %v4058_v44 = vadd.f32 %v4007_v46, %v3628_v39 }
 0x214   : > { %4213 = vst.msk [vmem:[%s6837_s25 + $0xe0] sm:$0xff] %vm4184_vm2, %v4176_v43  ;;  %v3631_v58 = vadd.f32 %v5473_v10, %v6811_v35  ;;  %v3587_v36 = vpop.f32.mrf.mxu1  ;;  %v4017_v47 = vpop.f32.mrf.mxu0 }
 0x215   : > { %4216 = vst.msk [vmem:[%s6837_s25 + $0xf8] sm:$0xff] %vm4184_vm2, %v4179_v23  ;;  %v4178_v49 = vmax.f32 %v4142_v37, 0.0  ;;  %v4145_v61 = vadd.f32 %v6827_v25, %v4102_v32  ;;  %v4101_v48 = vmul.f32 %v6820_v28, %v4058_v44  ;;  %v3630_v1 = vadd.f32 %v3587_v36, %v6814_v31 }
 0x216   : > { %v4061_v8 = vadd.f32 %v5529_v55, %v3631_v58 }
 0x217   : > { %4215 = vst.msk [vmem:[%s6837_s25 + $0xf0] sm:$0xff] %vm4184_vm2, %v4178_v49  ;;  %v4181_v27 = vmax.f32 %v4145_v61, 0.0  ;;  %v4144_v35 = vadd.f32 %v6827_v25, %v4101_v48  ;;  %v4060_v13 = vadd.f32 %v4017_v47, %v3630_v1 }
 0x218   : > { %v4104_v45 = vmul.f32 %v6820_v28, %v4061_v8 }
 0x219   : > { %4218 = vst.msk [vmem:[%s6837_s25 + $0x108] sm:$0xff] %vm4184_vm2, %v4181_v27  ;;  %v4180_v56 = vmax.f32 %v4144_v35, 0.0  ;;  %v4103_v15 = vmul.f32 %v6820_v28, %v4060_v13 }
 0x21a   : > { %v4147_v26 = vadd.f32 %v6827_v25, %v4104_v45 }
 0x21b   : > { %4217 = vst.msk [vmem:[%s6837_s25 + $0x100] sm:$0xff] %vm4184_vm2, %v4180_v56  ;;  %v4146_v31 = vadd.f32 %v6827_v25, %v4103_v15 }
 0x21c   : > { %v4183_v5 = vmax.f32 %v4147_v26, 0.0 }
 0x21d   : > { %v4182_v16 = vmax.f32 %v4146_v31, 0.0 }
 0x21e   : > { %4220 = vst.msk [vmem:[%s6837_s25 + $0x118] sm:$0xff] %vm4184_vm2, %v4183_v5 }
 0x21f   : > { %4219 = vst.msk [vmem:[%s6837_s25 + $0x110] sm:$0xff] %vm4184_vm2, %v4182_v16 }
 0x220 PF: > { %s14_s17 = sadd.s32 1, %s5580_s17   ;;  %s7026_s15 = smov %s5576_s16 }
 0x221   : > { %p11_p5 = scmp.ge.s32.totalorder %s14_s17, 4   ;;  %s7027_s16 = smov %s7029_s18 }
 0x223   :  { %13 = sbr.rel (!%p11_p5) target bundleno = 2 (0x2), region = 83 }

</bundles_post_ra>
